<compile_context>
chip_gen: v7x
topology: tpu7x:2x2x1
jax: 0.10.0
libtpu: 0.0.40
codegen_flags: <defaults>
</compile_context>

<pallas_src>
import functools

import jax
import jax.numpy as jnp
from jax.experimental import pallas as pl
from jax.experimental.pallas import tpu as pltpu


# ---------------------------------------------------------------------------
# Pallas kernel: stride-1 conv1d with symmetric zero-padding `pad`, expressed
# as one matmul per output-channel tile against a resident im2col slab.
# ---------------------------------------------------------------------------
def _conv1d_im2col_kernel(x_ref, w_ref, b_ref, o_ref, col_ref, *, ksize, pad):
    # x_ref:   (C_in, L_in)      bf16, resident across the whole grid
    # w_ref:   (TCO, K*C_in)     bf16 weight tile, columns ordered [k*C_in+ci]
    # b_ref:   (TCO, 1)          f32 bias tile
    # o_ref:   (TCO, L_out)      output tile
    # col_ref: (K*C_in, L_out)   bf16 VMEM scratch (persists across grid steps)
    c_in, l_in = x_ref.shape
    l_out = o_ref.shape[-1]

    @pl.when(pl.program_id(0) == 0)
    def _build_im2col():
        # Built once; the K unaligned lane-shifted copies (and the zero
        # padding of the transposed conv) happen here, not on every step.
        if pad > 0:
            col_ref[...] = jnp.zeros_like(col_ref)
        for k in range(ksize):
            dst_lo = max(0, pad - k)          # static Python ints
            src_lo = max(0, k - pad)
            n = min(l_in - src_lo, l_out - dst_lo)
            col_ref[k * c_in:(k + 1) * c_in, dst_lo:dst_lo + n] = (
                x_ref[:, src_lo:src_lo + n])

    acc = jnp.dot(w_ref[...], col_ref[...],
                  preferred_element_type=jnp.float32)      # bf16 MXU, f32 acc
    o_ref[...] = (acc + b_ref[...]).astype(o_ref.dtype)


def _round_up(n, m):
    return (n + m - 1) // m * m


def conv1d_pallas(x, w_flat, b, *, ksize, pad=0, tco=128,
                  out_dtype=jnp.float32):
    """Stride-1 1-D convolution with symmetric zero padding `pad`.

    x:      (C_in, L_in)  float      (cast to bf16 for the MXU)
    w_flat: (C_out, K*C_in) bf16     flattened weight, w_flat[co, k*C_in+ci]
                                     == w[co, ci, k]
    b:      (C_out,) f32
    returns (C_out, L_in + 2*pad - K + 1) in out_dtype
    """
    c_in, l_in = x.shape
    c_out, kc = w_flat.shape
    assert kc == ksize * c_in
    l_out = l_in + 2 * pad - ksize + 1

    # Tile the output-channel axis; clamp tile to the (8-aligned) channel
    # count and zero-pad C_out up to a tile multiple when it doesn't divide.
    tco = min(tco, _round_up(c_out, 8))
    c_out_pad = _round_up(c_out, tco)
    if c_out_pad != c_out:
        # NOTE: at the real module sizes do this padding once at init instead.
        w_flat = jnp.pad(w_flat, ((0, c_out_pad - c_out), (0, 0)))
        b = jnp.pad(b, (0, c_out_pad - c_out))

    x = x.astype(jnp.bfloat16)
    w_flat = w_flat.astype(jnp.bfloat16)
    b2 = b.astype(jnp.float32).reshape(c_out_pad, 1)

    grid = (c_out_pad // tco,)
    kern = functools.partial(_conv1d_im2col_kernel, ksize=ksize, pad=pad)
    out = pl.pallas_call(
        kern,
        out_shape=jax.ShapeDtypeStruct((c_out_pad, l_out), out_dtype),
        grid_spec=pltpu.PrefetchScalarGridSpec(
            num_scalar_prefetch=0,
            grid=grid,
            in_specs=[
                pl.BlockSpec((c_in, l_in), lambda i: (0, 0)),   # resident x
                pl.BlockSpec((tco, kc), lambda i: (i, 0)),      # weight tile
                pl.BlockSpec((tco, 1), lambda i: (i, 0)),       # bias tile
            ],
            out_specs=pl.BlockSpec((tco, l_out), lambda i: (i, 0)),
            scratch_shapes=[pltpu.VMEM((ksize * c_in, l_out), jnp.bfloat16)],
        ),
        compiler_params=pltpu.CompilerParams(
            # "arbitrary": the im2col scratch is built at program_id==0 and
            # reused by all later steps -> grid must run sequentially.
            dimension_semantics=("arbitrary",),
            vmem_limit_bytes=48 * 1024 * 1024,
        ),
    )(x, w_flat, b2)
    return out[:c_out] if c_out_pad != c_out else out


# ---------------------------------------------------------------------------
# Weight preparation (done ONCE at init — no per-call transposes/flips)
# ---------------------------------------------------------------------------
def _flatten_conv_weight(w):
    # PyTorch Conv1d weight (C_out, C_in, K) -> (C_out, K*C_in),
    # column order [k*C_in + ci] to match the im2col row order.
    c_out, c_in, k = w.shape
    return jnp.transpose(w, (0, 2, 1)).reshape(c_out, k * c_in)


def _flatten_convtranspose_weight(w_t):
    # PyTorch ConvTranspose1d weight (C_in, C_out, K).  A stride-1 transposed
    # conv == valid conv on a (K-1)-zero-padded input with the flipped,
    # channel-transposed weight:  w_eq[co, ci, k] = w_t[ci, co, K-1-k].
    w_eq = jnp.transpose(jnp.flip(w_t, axis=-1), (1, 0, 2))   # (C_out, C_in, K)
    return _flatten_conv_weight(w_eq)


# ---------------------------------------------------------------------------
# AutoEncoder: Conv1d(C_IN, C_HID, K) -> ConvTranspose1d(C_HID, C_IN, K)
# Original module: C_IN=1025, C_HID=2000, L=547.  Scaled-down test shapes:
# ---------------------------------------------------------------------------
C_IN = 48        # original: 1025
C_HID = 192      # original: 2000   (192 % 128 != 0 -> exercises C_out padding)
KSIZE = 8
L = 135          # original: 547    (conv output length = L - K + 1 = 128)


def init_params(key):
    k1, k2, k3, k4 = jax.random.split(key, 4)
    bound1 = 1.0 / (C_IN * KSIZE) ** 0.5     # Conv1d: fan_in = C_in * K
    bound2 = 1.0 / (C_IN * KSIZE) ** 0.5     # ConvTranspose1d: fan_in = C_out * K
    conv1_w = jax.random.uniform(k1, (C_HID, C_IN, KSIZE), jnp.float32,
                                 -bound1, bound1)
    conv1_b = jax.random.uniform(k2, (C_HID,), jnp.float32, -bound1, bound1)
    convt_w = jax.random.uniform(k3, (C_HID, C_IN, KSIZE), jnp.float32,
                                 -bound2, bound2)
    convt_b = jax.random.uniform(k4, (C_IN,), jnp.float32, -bound2, bound2)
    return {
        # raw PyTorch-layout f32 copies (reference / checkpoint interop only)
        "conv1_w": conv1_w, "conv1_b": conv1_b,
        "convt_w": convt_w, "convt_b": convt_b,
        # kernel-ready weights: layout glue + bf16 cast done once, here
        "w1_flat": _flatten_conv_weight(conv1_w).astype(jnp.bfloat16),
        "w2_flat": _flatten_convtranspose_weight(convt_w).astype(jnp.bfloat16),
    }


@jax.jit
def autoencoder_forward(params, x):
    """Mirrors AutoEncoder.forward: view -> conv1 -> conv1_t -> view back."""
    xshape = x.shape
    xr = x.astype(jnp.float32).reshape(C_IN, L)       # N=1 squeezed (NCL)
    h = conv1d_pallas(xr, params["w1_flat"], params["conv1_b"],
                      ksize=KSIZE, pad=0, tco=128, out_dtype=jnp.bfloat16)
    y = conv1d_pallas(h, params["w2_flat"], params["convt_b"],
                      ksize=KSIZE, pad=KSIZE - 1, tco=128,
                      out_dtype=jnp.float32)
    return y.reshape(xshape)


# ---------------------------------------------------------------------------
# Pure-JAX reference (uses the raw PyTorch-layout weights; emulates the bf16
# quantization of weights/activations so tolerances stay tight).
# ---------------------------------------------------------------------------
def _reference_forward(params, x):
    bf = lambda a: a.astype(jnp.bfloat16).astype(jnp.float32)
    w1, b1 = bf(params["conv1_w"]), params["conv1_b"]
    wt, bt = bf(params["convt_w"]), params["convt_b"]
    xr = bf(x.astype(jnp.float32).reshape(C_IN, L))
    l1 = L - KSIZE + 1
    # Conv1d (valid)
    patches = jnp.stack([xr[:, k:k + l1] for k in range(KSIZE)], axis=-1)
    h = jnp.einsum("oik,ilk->ol", w1, patches) + b1[:, None]
    h = bf(h)
    # ConvTranspose1d, stride 1:  y[:, s+k] += wt[:, :, k].T @ h[:, s]
    y = jnp.zeros((C_IN, L), jnp.float32)
    for k in range(KSIZE):
        y = y.at[:, k:k + l1].add(jnp.einsum("io,il->ol", wt[:, :, k], h))
    y = y + bt[:, None]
    return y.reshape(x.shape)


if __name__ == "__main__":
    key = jax.random.PRNGKey(0)
    pkey, xkey = jax.random.split(key)
    params = init_params(pkey)

    # input in the "pre-view" shape, like the numpy spectrogram in the module
    # (torch.from_numpy host conversion has no Pallas equivalent / not needed)
    x = jax.random.normal(xkey, (C_IN, L), dtype=jnp.float32)

    out = jax.block_until_ready(autoencoder_forward(params, x))
    assert out.shape == x.shape and out.dtype == jnp.float32

    ref = _reference_forward(params, x)
    max_err = float(jnp.max(jnp.abs(out - ref)))
    assert jnp.allclose(out, ref, rtol=2e-2, atol=2e-2), max_err

    print("KERNEL_OK")
</pallas_src>

<mosaic_0001>
module attributes {stable_mosaic.version = 11 : i64} {
  func.func @_conv1d_im2col_kernel(%arg0: i32, %arg1: memref<48x135xbf16, #tpu.memory_space<vmem>>, %arg2: memref<128x384xbf16, #tpu.memory_space<vmem>>, %arg3: memref<128x1xf32, #tpu.memory_space<vmem>>, %arg4: memref<128x128xbf16, #tpu.memory_space<vmem>>, %arg5: memref<384x128xbf16, #tpu.memory_space<vmem>>) attributes {dimension_semantics = [#tpu.dimension_semantics<arbitrary>], iteration_bounds = array<i64: 2>, scalar_prefetch = 0 : i64, scratch_operands = 1 : i64, tpu.core_type = #tpu.core_type<tc>, window_params = [{pipeline_mode = #tpu.pipeline_mode<synchronous>, transform_indices = @transform_0, window_bounds = array<i64: 48, 135>}, {transform_indices = @transform_1, window_bounds = array<i64: 128, 384>}, {transform_indices = @transform_2, window_bounds = array<i64: 128, 1>}, {transform_indices = @transform_3, window_bounds = array<i64: 128, 128>}]} {
    %c0_i32 = arith.constant 0 : i32
    %0 = arith.cmpi eq, %arg0, %c0_i32 : i32
    %1 = arith.extui %0 : i1 to i32
    %c0_i32_0 = arith.constant 0 : i32
    %2 = arith.cmpi ne, %1, %c0_i32_0 : i32
    scf.if %2 {
      %c0_8 = arith.constant 0 : index
      %c0_9 = arith.constant 0 : index
      %11 = vector.load %arg1[%c0_8, %c0_9] : memref<48x135xbf16, #tpu.memory_space<vmem>>, vector<48x128xbf16>
      %c0_10 = arith.constant 0 : index
      %c0_11 = arith.constant 0 : index
      %12 = vector.load %arg5[%c0_10, %c0_11] : memref<384x128xbf16, #tpu.memory_space<vmem>>, vector<48x128xbf16>
      tpu.vector_store %arg5[%c0_10, %c0_11], %11 {strides = array<i32>} : memref<384x128xbf16, #tpu.memory_space<vmem>>, vector<48x128xbf16>,
      %c0_12 = arith.constant 0 : index
      %c1 = arith.constant 1 : index
      %13 = vector.load %arg1[%c0_12, %c1] : memref<48x135xbf16, #tpu.memory_space<vmem>>, vector<48x128xbf16>
      %c48 = arith.constant 48 : index
      %c0_13 = arith.constant 0 : index
      %14 = vector.load %arg5[%c48, %c0_13] : memref<384x128xbf16, #tpu.memory_space<vmem>>, vector<48x128xbf16>
      tpu.vector_store %arg5[%c48, %c0_13], %13 {strides = array<i32>} : memref<384x128xbf16, #tpu.memory_space<vmem>>, vector<48x128xbf16>,
      %c0_14 = arith.constant 0 : index
      %c2 = arith.constant 2 : index
      %15 = vector.load %arg1[%c0_14, %c2] : memref<48x135xbf16, #tpu.memory_space<vmem>>, vector<48x128xbf16>
      %c96 = arith.constant 96 : index
      %c0_15 = arith.constant 0 : index
      %16 = vector.load %arg5[%c96, %c0_15] : memref<384x128xbf16, #tpu.memory_space<vmem>>, vector<48x128xbf16>
      tpu.vector_store %arg5[%c96, %c0_15], %15 {strides = array<i32>} : memref<384x128xbf16, #tpu.memory_space<vmem>>, vector<48x128xbf16>,
      %c0_16 = arith.constant 0 : index
      %c3 = arith.constant 3 : index
      %17 = vector.load %arg1[%c0_16, %c3] : memref<48x135xbf16, #tpu.memory_space<vmem>>, vector<48x128xbf16>
      %c144 = arith.constant 144 : index
      %c0_17 = arith.constant 0 : index
      %18 = vector.load %arg5[%c144, %c0_17] : memref<384x128xbf16, #tpu.memory_space<vmem>>, vector<48x128xbf16>
      tpu.vector_store %arg5[%c144, %c0_17], %17 {strides = array<i32>} : memref<384x128xbf16, #tpu.memory_space<vmem>>, vector<48x128xbf16>,
      %c0_18 = arith.constant 0 : index
      %c4 = arith.constant 4 : index
      %19 = vector.load %arg1[%c0_18, %c4] : memref<48x135xbf16, #tpu.memory_space<vmem>>, vector<48x128xbf16>
      %c192 = arith.constant 192 : index
      %c0_19 = arith.constant 0 : index
      %20 = vector.load %arg5[%c192, %c0_19] : memref<384x128xbf16, #tpu.memory_space<vmem>>, vector<48x128xbf16>
      tpu.vector_store %arg5[%c192, %c0_19], %19 {strides = array<i32>} : memref<384x128xbf16, #tpu.memory_space<vmem>>, vector<48x128xbf16>,
      %c0_20 = arith.constant 0 : index
      %c5 = arith.constant 5 : index
      %21 = vector.load %arg1[%c0_20, %c5] : memref<48x135xbf16, #tpu.memory_space<vmem>>, vector<48x128xbf16>
      %c240 = arith.constant 240 : index
      %c0_21 = arith.constant 0 : index
      %22 = vector.load %arg5[%c240, %c0_21] : memref<384x128xbf16, #tpu.memory_space<vmem>>, vector<48x128xbf16>
      tpu.vector_store %arg5[%c240, %c0_21], %21 {strides = array<i32>} : memref<384x128xbf16, #tpu.memory_space<vmem>>, vector<48x128xbf16>,
      %c0_22 = arith.constant 0 : index
      %c6 = arith.constant 6 : index
      %23 = vector.load %arg1[%c0_22, %c6] : memref<48x135xbf16, #tpu.memory_space<vmem>>, vector<48x128xbf16>
      %c288 = arith.constant 288 : index
      %c0_23 = arith.constant 0 : index
      %24 = vector.load %arg5[%c288, %c0_23] : memref<384x128xbf16, #tpu.memory_space<vmem>>, vector<48x128xbf16>
      tpu.vector_store %arg5[%c288, %c0_23], %23 {strides = array<i32>} : memref<384x128xbf16, #tpu.memory_space<vmem>>, vector<48x128xbf16>,
      %c0_24 = arith.constant 0 : index
      %c7 = arith.constant 7 : index
      %25 = vector.load %arg1[%c0_24, %c7] : memref<48x135xbf16, #tpu.memory_space<vmem>>, vector<48x128xbf16>
      %c336 = arith.constant 336 : index
      %c0_25 = arith.constant 0 : index
      %26 = vector.load %arg5[%c336, %c0_25] : memref<384x128xbf16, #tpu.memory_space<vmem>>, vector<48x128xbf16>
      tpu.vector_store %arg5[%c336, %c0_25], %25 {strides = array<i32>} : memref<384x128xbf16, #tpu.memory_space<vmem>>, vector<48x128xbf16>,
    } else {
    }
    %c0 = arith.constant 0 : index
    %c0_1 = arith.constant 0 : index
    %3 = vector.load %arg2[%c0, %c0_1] : memref<128x384xbf16, #tpu.memory_space<vmem>>, vector<128x384xbf16>
    %c0_2 = arith.constant 0 : index
    %c0_3 = arith.constant 0 : index
    %4 = vector.load %arg5[%c0_2, %c0_3] : memref<384x128xbf16, #tpu.memory_space<vmem>>, vector<384x128xbf16>
    %cst = arith.constant dense<0.000000e+00> : vector<128x128xf32>
    %5 = tpu.matmul %3, %4, %cst {dimension_numbers = #tpu.dot_dimension_numbers<[1], [0], [0], [1], [0, 0, 1, 1], [], []>} : vector<128x384xbf16>, vector<384x128xbf16>, vector<128x128xf32> -> vector<128x128xf32>
    %c0_4 = arith.constant 0 : index
    %c0_5 = arith.constant 0 : index
    %6 = vector.load %arg3[%c0_4, %c0_5] : memref<128x1xf32, #tpu.memory_space<vmem>>, vector<128x1xf32>
    %7 = vector.broadcast %6 : vector<128x1xf32> to vector<128x128xf32>
    %8 = arith.addf %5, %7 : vector<128x128xf32>
    %9 = arith.truncf %8 : vector<128x128xf32> to vector<128x128xbf16>
    %c0_6 = arith.constant 0 : index
    %c0_7 = arith.constant 0 : index
    %10 = vector.load %arg4[%c0_6, %c0_7] : memref<128x128xbf16, #tpu.memory_space<vmem>>, vector<128x128xbf16>
    tpu.vector_store %arg4[%c0_6, %c0_7], %9 {strides = array<i32>} : memref<128x128xbf16, #tpu.memory_space<vmem>>, vector<128x128xbf16>,
    return
  }
  func.func @transform_0(%arg0: i32) -> (i32, i32) {
    %c0_i32 = arith.constant 0 : i32
    %c0_i32_0 = arith.constant 0 : i32
    %c0_i32_1 = arith.constant 0 : i32
    return %c0_i32, %c0_i32_0 : i32, i32
  }
  func.func @transform_1(%arg0: i32) -> (i32, i32) {
    %c0_i32 = arith.constant 0 : i32
    %c0_i32_0 = arith.constant 0 : i32
    return %arg0, %c0_i32 : i32, i32
  }
  func.func @transform_2(%arg0: i32) -> (i32, i32) {
    %c0_i32 = arith.constant 0 : i32
    %c0_i32_0 = arith.constant 0 : i32
    return %arg0, %c0_i32 : i32, i32
  }
  func.func @transform_3(%arg0: i32) -> (i32, i32) {
    %c0_i32 = arith.constant 0 : i32
    %c0_i32_0 = arith.constant 0 : i32
    return %arg0, %c0_i32 : i32, i32
  }
}

module attributes {stable_mosaic.version = 11 : i64} {
  func.func @_conv1d_im2col_kernel(%arg0: i32, %arg1: memref<192x128xbf16, #tpu.memory_space<vmem>>, %arg2: memref<48x1536xbf16, #tpu.memory_space<vmem>>, %arg3: memref<48x1xf32, #tpu.memory_space<vmem>>, %arg4: memref<48x135xf32, #tpu.memory_space<vmem>>, %arg5: memref<1536x135xbf16, #tpu.memory_space<vmem>>) attributes {dimension_semantics = [#tpu.dimension_semantics<arbitrary>], iteration_bounds = array<i64: 1>, scalar_prefetch = 0 : i64, scratch_operands = 1 : i64, tpu.core_type = #tpu.core_type<tc>, window_params = [{pipeline_mode = #tpu.pipeline_mode<synchronous>, transform_indices = @transform_0, window_bounds = array<i64: 192, 128>}, {transform_indices = @transform_1, window_bounds = array<i64: 48, 1536>}, {transform_indices = @transform_2, window_bounds = array<i64: 48, 1>}, {transform_indices = @transform_3, window_bounds = array<i64: 48, 135>}]} {
    %c0_i32 = arith.constant 0 : i32
    %0 = arith.cmpi eq, %arg0, %c0_i32 : i32
    %1 = arith.extui %0 : i1 to i32
    %c0_i32_0 = arith.constant 0 : i32
    %2 = arith.cmpi ne, %1, %c0_i32_0 : i32
    scf.if %2 {
      %cst_8 = arith.constant 0.000000e+00 : bf16
      %10 = vector.broadcast %cst_8 : bf16 to vector<1536x135xbf16>
      %c0_9 = arith.constant 0 : index
      %c0_10 = arith.constant 0 : index
      %11 = vector.load %arg5[%c0_9, %c0_10] : memref<1536x135xbf16, #tpu.memory_space<vmem>>, vector<1536x135xbf16>
      tpu.vector_store %arg5[%c0_9, %c0_10], %10 {strides = array<i32>} : memref<1536x135xbf16, #tpu.memory_space<vmem>>, vector<1536x135xbf16>,
      %c0_11 = arith.constant 0 : index
      %c0_12 = arith.constant 0 : index
      %12 = vector.load %arg1[%c0_11, %c0_12] : memref<192x128xbf16, #tpu.memory_space<vmem>>, vector<192x128xbf16>
      %c0_13 = arith.constant 0 : index
      %c7 = arith.constant 7 : index
      %13 = vector.load %arg5[%c0_13, %c7] : memref<1536x135xbf16, #tpu.memory_space<vmem>>, vector<192x128xbf16>
      tpu.vector_store %arg5[%c0_13, %c7], %12 {strides = array<i32>} : memref<1536x135xbf16, #tpu.memory_space<vmem>>, vector<192x128xbf16>,
      %c0_14 = arith.constant 0 : index
      %c0_15 = arith.constant 0 : index
      %14 = vector.load %arg1[%c0_14, %c0_15] : memref<192x128xbf16, #tpu.memory_space<vmem>>, vector<192x128xbf16>
      %c192 = arith.constant 192 : index
      %c6 = arith.constant 6 : index
      %15 = vector.load %arg5[%c192, %c6] : memref<1536x135xbf16, #tpu.memory_space<vmem>>, vector<192x128xbf16>
      tpu.vector_store %arg5[%c192, %c6], %14 {strides = array<i32>} : memref<1536x135xbf16, #tpu.memory_space<vmem>>, vector<192x128xbf16>,
      %c0_16 = arith.constant 0 : index
      %c0_17 = arith.constant 0 : index
      %16 = vector.load %arg1[%c0_16, %c0_17] : memref<192x128xbf16, #tpu.memory_space<vmem>>, vector<192x128xbf16>
      %c384 = arith.constant 384 : index
      %c5 = arith.constant 5 : index
      %17 = vector.load %arg5[%c384, %c5] : memref<1536x135xbf16, #tpu.memory_space<vmem>>, vector<192x128xbf16>
      tpu.vector_store %arg5[%c384, %c5], %16 {strides = array<i32>} : memref<1536x135xbf16, #tpu.memory_space<vmem>>, vector<192x128xbf16>,
      %c0_18 = arith.constant 0 : index
      %c0_19 = arith.constant 0 : index
      %18 = vector.load %arg1[%c0_18, %c0_19] : memref<192x128xbf16, #tpu.memory_space<vmem>>, vector<192x128xbf16>
      %c576 = arith.constant 576 : index
      %c4 = arith.constant 4 : index
      %19 = vector.load %arg5[%c576, %c4] : memref<1536x135xbf16, #tpu.memory_space<vmem>>, vector<192x128xbf16>
      tpu.vector_store %arg5[%c576, %c4], %18 {strides = array<i32>} : memref<1536x135xbf16, #tpu.memory_space<vmem>>, vector<192x128xbf16>,
      %c0_20 = arith.constant 0 : index
      %c0_21 = arith.constant 0 : index
      %20 = vector.load %arg1[%c0_20, %c0_21] : memref<192x128xbf16, #tpu.memory_space<vmem>>, vector<192x128xbf16>
      %c768 = arith.constant 768 : index
      %c3 = arith.constant 3 : index
      %21 = vector.load %arg5[%c768, %c3] : memref<1536x135xbf16, #tpu.memory_space<vmem>>, vector<192x128xbf16>
      tpu.vector_store %arg5[%c768, %c3], %20 {strides = array<i32>} : memref<1536x135xbf16, #tpu.memory_space<vmem>>, vector<192x128xbf16>,
      %c0_22 = arith.constant 0 : index
      %c0_23 = arith.constant 0 : index
      %22 = vector.load %arg1[%c0_22, %c0_23] : memref<192x128xbf16, #tpu.memory_space<vmem>>, vector<192x128xbf16>
      %c960 = arith.constant 960 : index
      %c2 = arith.constant 2 : index
      %23 = vector.load %arg5[%c960, %c2] : memref<1536x135xbf16, #tpu.memory_space<vmem>>, vector<192x128xbf16>
      tpu.vector_store %arg5[%c960, %c2], %22 {strides = array<i32>} : memref<1536x135xbf16, #tpu.memory_space<vmem>>, vector<192x128xbf16>,
      %c0_24 = arith.constant 0 : index
      %c0_25 = arith.constant 0 : index
      %24 = vector.load %arg1[%c0_24, %c0_25] : memref<192x128xbf16, #tpu.memory_space<vmem>>, vector<192x128xbf16>
      %c1152 = arith.constant 1152 : index
      %c1 = arith.constant 1 : index
      %25 = vector.load %arg5[%c1152, %c1] : memref<1536x135xbf16, #tpu.memory_space<vmem>>, vector<192x128xbf16>
      tpu.vector_store %arg5[%c1152, %c1], %24 {strides = array<i32>} : memref<1536x135xbf16, #tpu.memory_space<vmem>>, vector<192x128xbf16>,
      %c0_26 = arith.constant 0 : index
      %c0_27 = arith.constant 0 : index
      %26 = vector.load %arg1[%c0_26, %c0_27] : memref<192x128xbf16, #tpu.memory_space<vmem>>, vector<192x128xbf16>
      %c1344 = arith.constant 1344 : index
      %c0_28 = arith.constant 0 : index
      %27 = vector.load %arg5[%c1344, %c0_28] : memref<1536x135xbf16, #tpu.memory_space<vmem>>, vector<192x128xbf16>
      tpu.vector_store %arg5[%c1344, %c0_28], %26 {strides = array<i32>} : memref<1536x135xbf16, #tpu.memory_space<vmem>>, vector<192x128xbf16>,
    } else {
    }
    %c0 = arith.constant 0 : index
    %c0_1 = arith.constant 0 : index
    %3 = vector.load %arg2[%c0, %c0_1] : memref<48x1536xbf16, #tpu.memory_space<vmem>>, vector<48x1536xbf16>
    %c0_2 = arith.constant 0 : index
    %c0_3 = arith.constant 0 : index
    %4 = vector.load %arg5[%c0_2, %c0_3] : memref<1536x135xbf16, #tpu.memory_space<vmem>>, vector<1536x135xbf16>
    %cst = arith.constant dense<0.000000e+00> : vector<48x135xf32>
    %5 = tpu.matmul %3, %4, %cst {dimension_numbers = #tpu.dot_dimension_numbers<[1], [0], [0], [1], [0, 0, 1, 1], [], []>} : vector<48x1536xbf16>, vector<1536x135xbf16>, vector<48x135xf32> -> vector<48x135xf32>
    %c0_4 = arith.constant 0 : index
    %c0_5 = arith.constant 0 : index
    %6 = vector.load %arg3[%c0_4, %c0_5] : memref<48x1xf32, #tpu.memory_space<vmem>>, vector<48x1xf32>
    %7 = vector.broadcast %6 : vector<48x1xf32> to vector<48x135xf32>
    %8 = arith.addf %5, %7 : vector<48x135xf32>
    %c0_6 = arith.constant 0 : index
    %c0_7 = arith.constant 0 : index
    %9 = vector.load %arg4[%c0_6, %c0_7] : memref<48x135xf32, #tpu.memory_space<vmem>>, vector<48x135xf32>
    tpu.vector_store %arg4[%c0_6, %c0_7], %8 {strides = array<i32>} : memref<48x135xf32, #tpu.memory_space<vmem>>, vector<48x135xf32>,
    return
  }
  func.func @transform_0(%arg0: i32) -> (i32, i32) {
    %c0_i32 = arith.constant 0 : i32
    %c0_i32_0 = arith.constant 0 : i32
    %c0_i32_1 = arith.constant 0 : i32
    return %c0_i32, %c0_i32_0 : i32, i32
  }
  func.func @transform_1(%arg0: i32) -> (i32, i32) {
    %c0_i32 = arith.constant 0 : i32
    %c0_i32_0 = arith.constant 0 : i32
    return %arg0, %c0_i32 : i32, i32
  }
  func.func @transform_2(%arg0: i32) -> (i32, i32) {
    %c0_i32 = arith.constant 0 : i32
    %c0_i32_0 = arith.constant 0 : i32
    return %arg0, %c0_i32 : i32, i32
  }
  func.func @transform_3(%arg0: i32) -> (i32, i32) {
    %c0_i32 = arith.constant 0 : i32
    %c0_i32_0 = arith.constant 0 : i32
    return %arg0, %c0_i32 : i32, i32
  }
}

</mosaic_0001>

<bundles_post_ra>
// kernel: autoencoder_forward.2
= control target key start
LH: loop header
LB: loop body
LE: loop exit
PB: predicated region body
PF: predicated region fallthrough
CT: control target
= control target key end

     0   :  { %s1590_s12 = smov 0   ;;  %s1697_s0 = inlined_call_operand.vmem [shape: bf16[48,135], index: 0, kind: input, shape index: {}]   ;;  %s1698_s1 = inlined_call_operand.vmem [shape: bf16[256,384], index: 1, kind: input, shape index: {}]   ;;  %s1699_s2 = inlined_call_operand.vmem [shape: f32[256,1], index: 2, kind: input, shape index: {}]   ;;  %s1700_s3 = inlined_call_operand.vmem [shape: bf16[256,128], index: 3, kind: output, shape index: {}]  }
   0x1 LB: > { %s1217_s13 = sadd.s32 4294967295, %s1560_s12   ;;  %p1221_p0 = scmp.ge.s32.totalorder %s1560_s12, 1  ;;  %s1560_s12 = sphi %s1590_s12, %s13_s12  }
   0x2   : > { %p150_p1 = scmp.lt.s32.totalorder %s1560_s12, 3 }
   0x4   : > { %p151_p2 = pnand %p1221_p0, %p150_p1 }
   0x5   : > { %s1222_s14 = sshll.u32 (!%p151_p2), %s1217_s13, 4  ;;  %p1228_p4 = scmp.ne.s32.totalorder (!%p151_p2), %s1217_s13, 0 }
   0x6   : > { %154 = sbr.rel (%p151_p2) target bundleno = 532 (0x214), region = 32  ;;  %p181_p3 = scmp.lt.s32.totalorder (!%p151_p2), %s1222_s14, 31 }
   0xd   : > { %s1702_s14 = smov (!%p181_p3, %s1222_s14), 31  ;;  %203 = sbr.rel (%p1228_p4) target bundleno = 215 (0xd7), region = 36 }
   0xe   : > { %s1491_s15 = smul.u32 12, %s1702_s14  ;;  %s1225_s16 = sshll.u32 %s1702_s14, 3  ;;  %v1508_v0 = vld [vmem:[%s1697_s0 + $0x10] ss:$8 sps:$4 sm:$0xff] (!%p1228_p4)   ;;  %v1510_v1 = vld [vmem:[%s1697_s0 + $0x14] ss:$8 sps:$4 sm:$0xff] (!%p1228_p4)  }
   0xf   : > { %s1601_s19 = scalar_lea.vmem %s1699_s2, %s1225_s16  ;;  %s1227_s20 = sshll.u32 %s1702_s14, 2  ;;  %v1511_v2 = vld [vmem:[%s1697_s0] ss:$8 sps:$4 sm:$0xff] (!%p1228_p4)   ;;  %v1513_v3 = vld [vmem:[%s1697_s0 + $0x4] ss:$8 sps:$4 sm:$0xff] (!%p1228_p4)   ;;  %vm273_vm0 = vcmask (!%p1228_p4), 1039360  }
  0x10   : > { %s1606_s23 = scalar_lea.vmem %s1698_s1, %s1491_s15  ;;  %s1611_s26 = scalar_lea.vmem %s1700_s3, %s1227_s20  ;;  %v1514_v4 = vld [vmem:[%s1697_s0 + $0x24] ss:$8 sps:$4 sm:$0xff] (!%p1228_p4)   ;;  %v1516_v5 = vld [vmem:[%s1697_s0 + $0x20] ss:$8 sps:$4 sm:$0xff] (!%p1228_p4)   ;;  %v1518_v7 = vld [vmem:[%s1697_s0 + $0x10] ss:$8 sps:$4 sm:$0xff] (!%p1228_p4)  }
  0x11   : > { %s1562_s4 = smov (!%p1228_p4), 127   ;;  %s1563_s14 = smov (!%p1228_p4), 126   ;;  %v1517_v6 = vld [vmem:[%s1697_s0] ss:$8 sps:$4 sm:$0xff] (!%p1228_p4)   ;;  %229 = vst [vmem:[#allocation2 + $0x8] sm:$0xff] (!%p1228_p4), %v1518_v7  ;;  %vm325_vm1 = vcmask (!%p1228_p4), 1031168  }
  0x12   : > { %265 = vrot.lane.b32.xlu1 (!%p1228_p4), %v1508_v0, %s1562_s4  ;;  %261 = vrot.lane.b32.xlu0 (!%p1228_p4), %v1511_v2, %s1562_s4  ;;  %s1564_s15 = smov (!%p1228_p4), 125   ;;  %s1565_s16 = smov (!%p1228_p4), 124   ;;  %v1519_v8 = vld [vmem:[%s1697_s0 + $0x20] ss:$8 sps:$4 sm:$0xff] (!%p1228_p4)   ;;  %228 = vst [vmem:[#allocation2] sm:$0xff] (!%p1228_p4), %v1517_v6  ;;  %vm377_vm2 = vcmask (!%p1228_p4), 1022976  }
  0x13   : > { %s1566_s17 = smov (!%p1228_p4), 123   ;;  %s1567_s18 = smov (!%p1228_p4), 122   ;;  %230 = vst [vmem:[#allocation2 + $0x10] sm:$0xff] (!%p1228_p4), %v1519_v8  ;;  %vm429_vm3 = vcmask (!%p1228_p4), 1014784   ;;  %vm481_vm4 = vcmask (!%p1228_p4), 1006592   ;;  %vm533_vm5 = vcmask (!%p1228_p4), 998400  }
  0x14   : > { %s1568_s28 = smov 121   ;;  %vm585_vm6 = vcmask 990208  }
  0x16   : > { %267 = vrot.lane.b32.xlu1 %v1510_v1, %s1562_s4  ;;  %263 = vrot.lane.b32.xlu0 %v1513_v3, %s1562_s4 }
  0x1a   : > { %271 = vrot.lane.b32.xlu1 %v1514_v4, %s1562_s4  ;;  %269 = vrot.lane.b32.xlu0 %v1516_v5, %s1562_s4 }
  0x1e   : > { %315 = vrot.lane.b32.xlu1 %v1513_v3, %s1563_s14  ;;  %313 = vrot.lane.b32.xlu0 %v1511_v2, %s1563_s14 }
  0x22   : > { %319 = vrot.lane.b32.xlu1 %v1510_v1, %s1563_s14  ;;  %317 = vrot.lane.b32.xlu0 %v1508_v0, %s1563_s14 }
  0x26   : > { %323 = vrot.lane.b32.xlu1 %v1514_v4, %s1563_s14  ;;  %321 = vrot.lane.b32.xlu0 %v1516_v5, %s1563_s14 }
  0x2a   : > { %367 = vrot.lane.b32.xlu1 %v1513_v3, %s1564_s15  ;;  %365 = vrot.lane.b32.xlu0 %v1511_v2, %s1564_s15 }
  0x2e   : > { %371 = vrot.lane.b32.xlu1 %v1510_v1, %s1564_s15  ;;  %369 = vrot.lane.b32.xlu0 %v1508_v0, %s1564_s15 }
  0x32   : > { %375 = vrot.lane.b32.xlu1 %v1514_v4, %s1564_s15  ;;  %373 = vrot.lane.b32.xlu0 %v1516_v5, %s1564_s15 }
  0x36   : > { %419 = vrot.lane.b32.xlu1 %v1513_v3, %s1565_s16  ;;  %417 = vrot.lane.b32.xlu0 %v1511_v2, %s1565_s16 }
  0x3a   : > { %423 = vrot.lane.b32.xlu1 %v1510_v1, %s1565_s16  ;;  %421 = vrot.lane.b32.xlu0 %v1508_v0, %s1565_s16 }
  0x3e   : > { %427 = vrot.lane.b32.xlu1 %v1514_v4, %s1565_s16  ;;  %425 = vrot.lane.b32.xlu0 %v1516_v5, %s1565_s16 }
  0x42   : > { %471 = vrot.lane.b32.xlu1 %v1513_v3, %s1566_s17  ;;  %469 = vrot.lane.b32.xlu0 %v1511_v2, %s1566_s17 }
  0x46   : > { %475 = vrot.lane.b32.xlu1 %v1510_v1, %s1566_s17  ;;  %473 = vrot.lane.b32.xlu0 %v1508_v0, %s1566_s17 }
  0x4a   : > { %479 = vrot.lane.b32.xlu1 %v1514_v4, %s1566_s17  ;;  %477 = vrot.lane.b32.xlu0 %v1516_v5, %s1566_s17 }
  0x4e   : > { %523 = vrot.lane.b32.xlu1 %v1513_v3, %s1567_s18  ;;  %521 = vrot.lane.b32.xlu0 %v1511_v2, %s1567_s18 }
  0x52   : > { %527 = vrot.lane.b32.xlu1 %v1510_v1, %s1567_s18  ;;  %525 = vrot.lane.b32.xlu0 %v1508_v0, %s1567_s18 }
  0x56   : > { %531 = vrot.lane.b32.xlu1 %v1514_v4, %s1567_s18  ;;  %529 = vrot.lane.b32.xlu0 %v1516_v5, %s1567_s18 }
  0x5a   : > { %575 = vrot.lane.b32.xlu1 %v1513_v3, %s1568_s28  ;;  %573 = vrot.lane.b32.xlu0 %v1511_v2, %s1568_s28 }
  0x5e   : > { %579 = vrot.lane.b32.xlu1 %v1510_v1, %s1568_s28  ;;  %577 = vrot.lane.b32.xlu0 %v1508_v0, %s1568_s28 }
  0x62   : > { %583 = vrot.lane.b32.xlu1 %v1514_v4, %s1568_s28  ;;  %581 = vrot.lane.b32.xlu0 %v1516_v5, %s1568_s28 }
  0x84   : > { %v266_v9 = vpop.permute.xlu1 %265  ;;  %v262_v10 = vpop.permute.xlu0 %261 }
  0x88   : > { %v268_v11 = vpop.permute.xlu1 %267  ;;  %v264_v13 = vpop.permute.xlu0 %263 }
  0x89   : > { %v275_v12 = vsel %vm273_vm0, %v266_v9, %v268_v11  ;;  %v274_v14 = vsel %vm273_vm0, %v262_v10, %v264_v13 }
  0x8a   : > { %281 = vst [vmem:[#allocation2 + $0x20] sm:$0xff] %v275_v12  ;;  %280 = vst [vmem:[#allocation2 + $0x18] sm:$0xff] %v274_v14 }
  0x8c   : > { %v272_v15 = vpop.permute.xlu1 %271  ;;  %v270_v16 = vpop.permute.xlu0 %269 }
  0x8d   : > { %v276_v17 = vsel %vm273_vm0, %v270_v16, %v272_v15 }
  0x8e   : > { %282 = vst [vmem:[#allocation2 + $0x28] sm:$0xff] %v276_v17 }
  0x90   : > { %v316_v18 = vpop.permute.xlu1 %315  ;;  %v314_v19 = vpop.permute.xlu0 %313 }
  0x91   : > { %v326_v20 = vsel %vm325_vm1, %v314_v19, %v316_v18 }
  0x92   : > { %332 = vst [vmem:[#allocation2 + $0x30] sm:$0xff] %v326_v20 }
  0x94   : > { %v320_v21 = vpop.permute.xlu1 %319  ;;  %v318_v22 = vpop.permute.xlu0 %317 }
  0x95   : > { %v327_v23 = vsel %vm325_vm1, %v318_v22, %v320_v21 }
  0x96   : > { %333 = vst [vmem:[#allocation2 + $0x38] sm:$0xff] %v327_v23 }
  0x98   : > { %v324_v24 = vpop.permute.xlu1 %323  ;;  %v322_v25 = vpop.permute.xlu0 %321 }
  0x99   : > { %v328_v26 = vsel %vm325_vm1, %v322_v25, %v324_v24 }
  0x9a   : > { %334 = vst [vmem:[#allocation2 + $0x40] sm:$0xff] %v328_v26 }
  0x9c   : > { %v368_v27 = vpop.permute.xlu1 %367  ;;  %v366_v28 = vpop.permute.xlu0 %365 }
  0x9d   : > { %v378_v29 = vsel %vm377_vm2, %v366_v28, %v368_v27 }
  0x9e   : > { %384 = vst [vmem:[#allocation2 + $0x48] sm:$0xff] %v378_v29 }
  0xa0   : > { %v372_v30 = vpop.permute.xlu1 %371  ;;  %v370_v31 = vpop.permute.xlu0 %369 }
  0xa1   : > { %v379_v32 = vsel %vm377_vm2, %v370_v31, %v372_v30 }
  0xa2   : > { %385 = vst [vmem:[#allocation2 + $0x50] sm:$0xff] %v379_v32 }
  0xa4   : > { %v376_v33 = vpop.permute.xlu1 %375  ;;  %v374_v34 = vpop.permute.xlu0 %373 }
  0xa5   : > { %v380_v35 = vsel %vm377_vm2, %v374_v34, %v376_v33 }
  0xa6   : > { %386 = vst [vmem:[#allocation2 + $0x58] sm:$0xff] %v380_v35 }
  0xa8   : > { %v420_v36 = vpop.permute.xlu1 %419  ;;  %v418_v37 = vpop.permute.xlu0 %417 }
  0xa9   : > { %v430_v38 = vsel %vm429_vm3, %v418_v37, %v420_v36 }
  0xaa   : > { %436 = vst [vmem:[#allocation2 + $0x60] sm:$0xff] %v430_v38 }
  0xac   : > { %v424_v39 = vpop.permute.xlu1 %423  ;;  %v422_v40 = vpop.permute.xlu0 %421 }
  0xad   : > { %v431_v41 = vsel %vm429_vm3, %v422_v40, %v424_v39 }
  0xae   : > { %437 = vst [vmem:[#allocation2 + $0x68] sm:$0xff] %v431_v41 }
  0xb0   : > { %v428_v42 = vpop.permute.xlu1 %427  ;;  %v426_v43 = vpop.permute.xlu0 %425 }
  0xb1   : > { %v432_v44 = vsel %vm429_vm3, %v426_v43, %v428_v42 }
  0xb2   : > { %438 = vst [vmem:[#allocation2 + $0x70] sm:$0xff] %v432_v44 }
  0xb4   : > { %v472_v45 = vpop.permute.xlu1 %471  ;;  %v470_v46 = vpop.permute.xlu0 %469 }
  0xb5   : > { %v482_v47 = vsel %vm481_vm4, %v470_v46, %v472_v45 }
  0xb6   : > { %488 = vst [vmem:[#allocation2 + $0x78] sm:$0xff] %v482_v47 }
  0xb8   : > { %v476_v48 = vpop.permute.xlu1 %475  ;;  %v474_v49 = vpop.permute.xlu0 %473 }
  0xb9   : > { %v483_v50 = vsel %vm481_vm4, %v474_v49, %v476_v48 }
  0xba   : > { %489 = vst [vmem:[#allocation2 + $0x80] sm:$0xff] %v483_v50 }
  0xbc   : > { %v480_v51 = vpop.permute.xlu1 %479  ;;  %v478_v52 = vpop.permute.xlu0 %477 }
  0xbd   : > { %v484_v53 = vsel %vm481_vm4, %v478_v52, %v480_v51 }
  0xbe   : > { %490 = vst [vmem:[#allocation2 + $0x88] sm:$0xff] %v484_v53 }
  0xc0   : > { %v524_v54 = vpop.permute.xlu1 %523  ;;  %v522_v55 = vpop.permute.xlu0 %521 }
  0xc1   : > { %v534_v56 = vsel %vm533_vm5, %v522_v55, %v524_v54 }
  0xc2   : > { %540 = vst [vmem:[#allocation2 + $0x90] sm:$0xff] %v534_v56 }
  0xc4   : > { %v528_v57 = vpop.permute.xlu1 %527  ;;  %v526_v58 = vpop.permute.xlu0 %525 }
  0xc5   : > { %v535_v59 = vsel %vm533_vm5, %v526_v58, %v528_v57 }
  0xc6   : > { %541 = vst [vmem:[#allocation2 + $0x98] sm:$0xff] %v535_v59 }
  0xc8   : > { %v532_v60 = vpop.permute.xlu1 %531  ;;  %v530_v61 = vpop.permute.xlu0 %529 }
  0xc9   : > { %v536_v62 = vsel %vm533_vm5, %v530_v61, %v532_v60 }
  0xca   : > { %542 = vst [vmem:[#allocation2 + $0xa0] sm:$0xff] %v536_v62 }
  0xcc   : > { %v576_v63 = vpop.permute.xlu1 %575  ;;  %v574_v0 = vpop.permute.xlu0 %573 }
  0xcd   : > { %v586_v1 = vsel %vm585_vm6, %v574_v0, %v576_v63 }
  0xce   : > { %592 = vst [vmem:[#allocation2 + $0xa8] sm:$0xff] %v586_v1 }
  0xd0   : > { %v580_v2 = vpop.permute.xlu1 %579  ;;  %v578_v3 = vpop.permute.xlu0 %577 }
  0xd1   : > { %v587_v4 = vsel %vm585_vm6, %v578_v3, %v580_v2 }
  0xd2   : > { %593 = vst [vmem:[#allocation2 + $0xb0] sm:$0xff] %v587_v4 }
  0xd4   : > { %v584_v5 = vpop.permute.xlu1 %583  ;;  %v582_v6 = vpop.permute.xlu0 %581 }
  0xd5   : > { %v588_v7 = vsel %vm585_vm6, %v582_v6, %v584_v5 }
  0xd6   : > { %594 = vst [vmem:[#allocation2 + $0xb8] sm:$0xff] %v588_v7 }
  0xd7 PF: > { %v635_v8 = vld [vmem:[#allocation2 + $0x40] sm:$0xff]  ;;  %v636_v10 = vld [vmem:[#allocation2 + $0x48] sm:$0xff]  ;;  %v1569_v12 = vmov 0   ;;  %v637_v15 = vld [vmem:[#allocation2 + $0x50] sm:$0xff] }
  0xd8   : > { %1379 = vmatprep.subr.bf16.mxu0 %v635_v8  ;;  %v643_v11 = vld [vmem:[#allocation2 + $0x80] sm:$0xff]  ;;  %1520 = vset.pattern.permute.xlu0 %v1569_v12  ;;  %v644_v13 = vld [vmem:[#allocation2 + $0x88] sm:$0xff]  ;;  %v645_v16 = vld [vmem:[#allocation2 + $0x90] sm:$0xff] }
  0xd9   : > { %1459 = vmatprep.subr.bf16.mxu1 %v643_v11  ;;  %1521 = vset.pattern.permute.xlu1 %v1569_v12  ;;  %v638_v18 = vld [vmem:[#allocation2 + $0x58] sm:$0xff]  ;;  %v1524_v19 = vld [vmem:[%s1606_s23 + $0x4] ss:$12 sps:$4 sm:$0xff]   ;;  %v1525_v21 = vld [vmem:[%s1606_s23 + $0x8] ss:$12 sps:$4 sm:$0xff]  }
  0xda   : > { %1460 = vmatpush3.bf16.msra.mxu1 %v643_v11  ;;  %v646_v20 = vld [vmem:[#allocation2 + $0x98] sm:$0xff]  ;;  %907 = vmatprep.mubr.bf16.mxu0 %v1524_v19  ;;  %v639_v23 = vld [vmem:[#allocation2 + $0x60] sm:$0xff]  ;;  %v640_v26 = vld [vmem:[#allocation2 + $0x68] sm:$0xff] }
  0xdb   : > { %v628_v14 = vld [vmem:[#allocation2 + $0x8] sm:$0xff]  ;;  %1461 = vmatprep.subr.bf16.mxu1 %v644_v13  ;;  %v630_v22 = vld [vmem:[#allocation2 + $0x18] sm:$0xff]  ;;  %1475 = vmatprep.mubr.bf16.mxu1 %v1525_v21  ;;  %v647_v24 = vld [vmem:[#allocation2 + $0xa0] sm:$0xff] }
  0xdc   : > { %v627_v9 = vld [vmem:[#allocation2] sm:$0xff]  ;;  %v648_v27 = vld [vmem:[#allocation2 + $0xa8] sm:$0xff]  ;;  %v641_v29 = vld [vmem:[#allocation2 + $0x70] sm:$0xff] }
  0xdd   : > { %1380 = vmatpush3.bf16.msra.mxu0 %v627_v9  ;;  %v629_v17 = vld [vmem:[#allocation2 + $0x10] sm:$0xff]  ;;  %v631_v25 = vld [vmem:[#allocation2 + $0x20] sm:$0xff]  ;;  %v632_v28 = vld [vmem:[#allocation2 + $0x28] sm:$0xff] }
  0xde   : > { %1381 = vmatprep.subr.bf16.mxu0 %v636_v10  ;;  %1462 = vmatpush3.bf16.msra.mxu1 %v644_v13  ;;  %v649_v30 = vld [vmem:[#allocation2 + $0xb0] sm:$0xff]  ;;  %v642_v32 = vld [vmem:[#allocation2 + $0x78] sm:$0xff]  ;;  %v651_v34 = vld [vmem:[%s1601_s19] sm:$0xff] }
  0xdf   : > { %1463 = vmatprep.subr.bf16.mxu1 %v645_v16  ;;  %v633_v31 = vld [vmem:[#allocation2 + $0x30] sm:$0xff]  ;;  %v650_v33 = vld [vmem:[#allocation2 + $0xb8] sm:$0xff]  ;;  %669 = vperm.xlu0 %1520, %v651_v34   ;;  %v1522_v37 = vld [vmem:[%s1606_s23] ss:$12 sps:$4 sm:$0xff]  }
  0xe0   : > { %v634_v35 = vld [vmem:[#allocation2 + $0x38] sm:$0xff]  ;;  %v653_v36 = vld [vmem:[%s1601_s19 + $0x10] sm:$0xff]  ;;  %v652_v38 = vld [vmem:[%s1601_s19 + $0x8] sm:$0xff] }
  0xe1   : > { %1382 = vmatpush3.bf16.msra.mxu0 %v628_v14  ;;  %679 = vperm.xlu1 %1521, %v653_v36   ;;  %v1526_v39 = vld [vmem:[%s1606_s23 + $0x20] ss:$12 sps:$4 sm:$0xff]   ;;  %v1527_v40 = vld [vmem:[%s1606_s23 + $0x1c] ss:$12 sps:$4 sm:$0xff]   ;;  %v1533_v42 = vld [vmem:[%s1606_s23 + $0x38] ss:$12 sps:$4 sm:$0xff]  }
  0xe2   : > { %1383 = vmatprep.subr.bf16.mxu0 %v637_v15  ;;  %1464 = vmatpush3.bf16.msra.mxu1 %v645_v16  ;;  %v654_v41 = vld [vmem:[%s1601_s19 + $0x18] sm:$0xff]  ;;  %v655_v43 = vld [vmem:[%s1601_s19 + $0x20] sm:$0xff]  ;;  %v656_v44 = vld [vmem:[%s1601_s19 + $0x28] sm:$0xff] }
  0xe3   : > { %1465 = vmatprep.subr.bf16.mxu1 %v646_v20  ;;  %674 = vperm.xlu0 %1520, %v652_v38   ;;  %v1529_v45 = vld [vmem:[%s1606_s23 + $0x18] ss:$12 sps:$4 sm:$0xff]   ;;  %v657_v46 = vld [vmem:[%s1601_s19 + $0x30] sm:$0xff]  ;;  %v660_v52 = vld [vmem:[%s1601_s19 + $0x48] sm:$0xff] }
  0xe4   : > { %v1530_v47 = vld [vmem:[%s1606_s23 + $0x34] ss:$12 sps:$4 sm:$0xff]   ;;  %v1534_v48 = vld [vmem:[%s1606_s23 + $0x50] ss:$12 sps:$4 sm:$0xff]   ;;  %v1535_v55 = vld [vmem:[%s1606_s23 + $0x4c] ss:$12 sps:$4 sm:$0xff]  }
  0xe5   : > { %1384 = vmatpush3.bf16.msra.mxu0 %v629_v17  ;;  %684 = vperm.xlu1 %1521, %v654_v41   ;;  %v658_v49 = vld [vmem:[%s1601_s19 + $0x38] sm:$0xff]  ;;  %v1541_v50 = vld [vmem:[%s1606_s23 + $0x68] ss:$12 sps:$4 sm:$0xff]   ;;  %v659_v51 = vld [vmem:[%s1601_s19 + $0x40] sm:$0xff] }
  0xe6   : > { %1385 = vmatprep.subr.bf16.mxu0 %v638_v18  ;;  %1466 = vmatpush3.bf16.msra.mxu1 %v646_v20  ;;  %v1532_v53 = vld [vmem:[%s1606_s23 + $0x30] ss:$12 sps:$4 sm:$0xff]   ;;  %v1542_v56 = vld [vmem:[%s1606_s23 + $0x80] ss:$12 sps:$4 sm:$0xff]   ;;  %v1549_v58 = vld [vmem:[%s1606_s23 + $0x98] ss:$12 sps:$4 sm:$0xff]  }
  0xe7   : > { %1467 = vmatprep.subr.bf16.mxu1 %v647_v24  ;;  %689 = vperm.xlu0 %1520, %v655_v43   ;;  %v661_v54 = vld [vmem:[%s1601_s19 + $0x50] sm:$0xff]  ;;  %v662_v57 = vld [vmem:[%s1601_s19 + $0x58] sm:$0xff]  ;;  %v663_v59 = vld [vmem:[%s1601_s19 + $0x60] sm:$0xff] }
  0xe8   : > { %v664_v60 = vld [vmem:[%s1601_s19 + $0x68] sm:$0xff]  ;;  %v665_v62 = vld [vmem:[%s1601_s19 + $0x70] sm:$0xff]  ;;  %v666_v1 = vld [vmem:[%s1601_s19 + $0x78] sm:$0xff] }
  0xe9   : > { %1386 = vmatpush3.bf16.msra.mxu0 %v630_v22  ;;  %694 = vperm.xlu1 %1521, %v656_v44   ;;  %v1537_v61 = vld [vmem:[%s1606_s23 + $0x48] ss:$12 sps:$4 sm:$0xff]   ;;  %v1538_v63 = vld [vmem:[%s1606_s23 + $0x64] ss:$12 sps:$4 sm:$0xff]   ;;  %v1540_v2 = vld [vmem:[%s1606_s23 + $0x60] ss:$12 sps:$4 sm:$0xff]  }
  0xea   : > { %1387 = vmatprep.subr.bf16.mxu0 %v639_v23  ;;  %1468 = vmatpush3.bf16.msra.mxu1 %v647_v24  ;;  %v1550_v0 = vld [vmem:[%s1606_s23 + $0xb0] ss:$12 sps:$4 sm:$0xff]   ;;  %v1545_v4 = vld [vmem:[%s1606_s23 + $0x78] ss:$12 sps:$4 sm:$0xff]   ;;  %v1546_v5 = vld [vmem:[%s1606_s23 + $0x94] ss:$12 sps:$4 sm:$0xff]  }
  0xeb   : > { %1469 = vmatprep.subr.bf16.mxu1 %v648_v27  ;;  %699 = vperm.xlu0 %1520, %v657_v46   ;;  %v1543_v3 = vld [vmem:[%s1606_s23 + $0x7c] ss:$12 sps:$4 sm:$0xff]   ;;  %v1551_v7 = vld [vmem:[%s1606_s23 + $0xac] ss:$12 sps:$4 sm:$0xff]  }
  0xec   : > { %v1548_v6 = vld [vmem:[%s1606_s23 + $0x90] ss:$12 sps:$4 sm:$0xff]   ;;  %v1553_v8 = vld [vmem:[%s1606_s23 + $0xa8] ss:$12 sps:$4 sm:$0xff]  }
  0xed   : > { %1388 = vmatpush3.bf16.msra.mxu0 %v631_v25  ;;  %704 = vperm.xlu1 %1521, %v658_v49  }
  0xee   : > { %1389 = vmatprep.subr.bf16.mxu0 %v640_v26  ;;  %1470 = vmatpush3.bf16.msra.mxu1 %v648_v27 }
  0xef   : > { %1471 = vmatprep.subr.bf16.mxu1 %v649_v30  ;;  %709 = vperm.xlu0 %1520, %v659_v51  }
  0xf1   : > { %1390 = vmatpush3.bf16.msra.mxu0 %v632_v28  ;;  %714 = vperm.xlu1 %1521, %v660_v52  }
  0xf2   : > { %1391 = vmatprep.subr.bf16.mxu0 %v641_v29  ;;  %1472 = vmatpush3.bf16.msra.mxu1 %v649_v30 }
  0xf3   : > { %1473 = vmatprep.subr.bf16.mxu1 %v650_v33  ;;  %719 = vperm.xlu0 %1520, %v661_v54  }
  0xf5   : > { %1392 = vmatpush3.bf16.msra.mxu0 %v633_v31  ;;  %724 = vperm.xlu1 %1521, %v662_v57  }
  0xf6   : > { %1393 = vmatprep.subr.bf16.mxu0 %v642_v32  ;;  %1474 = vmatpush3.bf16.msra.mxu1 %v650_v33 }
  0xf7   : > { %729 = vperm.xlu0 %1520, %v663_v59  }
  0xf9   : > { %1394 = vmatpush3.bf16.msra.mxu0 %v634_v35  ;;  %1476 = vmatmul.mubr.bf16.vlgmr.msra.gmra.mrb[0].mxu1 %v1526_v39 }
  0xfa   : > { %1479 = vmatprep.mubr.bf16.mxu1 %v1533_v42  ;;  %734 = vperm.xlu1 %1521, %v664_v60  }
  0xfb   : > { %739 = vperm.xlu0 %1520, %v665_v62  }
  0xfc   : > { %908 = vmatmul.mubr.bf16.vlgmr.msra.gmra.mrb[0].mxu0 %v1522_v37 }
  0xfd   : > { %915 = vmatprep.mubr.bf16.mxu0 %v1527_v40 }
  0xfe   : > { %744 = vperm.xlu1 %1521, %v666_v1  }
 0x101   : > { %1480 = vmatmul.mubr.bf16.gmra.mrb[4].mxu1 %v1534_v48 }
 0x102   : > { %1483 = vmatprep.mubr.bf16.mxu1 %v1541_v50 }
 0x104   : > { %916 = vmatmul.mubr.bf16.gmra.mrb[4].mxu0 %v1529_v45 }
 0x105   : > { %923 = vmatprep.mubr.bf16.mxu0 %v1530_v47 }
 0x109   : > { %1484 = vmatmul.mubr.bf16.gmra.mrb[8].mxu1 %v1542_v56 }
 0x10a   : > { %1487 = vmatprep.mubr.bf16.mxu1 %v1549_v58 }
 0x10c   : > { %924 = vmatmul.mubr.bf16.gmra.mrb[8].mxu0 %v1532_v53 }
 0x10d   : > { %931 = vmatprep.mubr.bf16.mxu0 %v1535_v55 }
 0x111   : > { %1488 = vmatmul.mubr.bf16.gmra.mrb[12].mxu1 %v1550_v0 }
 0x114   : > { %932 = vmatmul.mubr.bf16.gmra.mrb[12].mxu0 %v1537_v61 }
 0x115   : > { %939 = vmatprep.mubr.bf16.mxu0 %v1538_v63 }
 0x11c   : > { %940 = vmatmul.mubr.bf16.gmra.mrb[16].mxu0 %v1540_v2 }
 0x11d   : > { %947 = vmatprep.mubr.bf16.mxu0 %v1543_v3 }
 0x124   : > { %948 = vmatmul.mubr.bf16.gmra.mrb[20].mxu0 %v1545_v4 }
 0x125   : > { %955 = vmatprep.mubr.bf16.mxu0 %v1546_v5 }
 0x12c   : > { %956 = vmatmul.mubr.bf16.gmra.mrb[24].mxu0 %v1548_v6 }
 0x12d   : > { %963 = vmatprep.mubr.bf16.mxu0 %v1551_v7 }
 0x134   : > { %964 = vmatmul.mubr.bf16.gmra.mrb[28].mxu0 %v1553_v8 }
 0x15e   : > { %v670_v9 = vpop.permute.xlu0 %669 }
 0x160   : > { %v680_v24 = vpop.permute.xlu1 %679 }
 0x162   : > { %v675_v11 = vpop.permute.xlu0 %674 }
 0x164   : > { %v685_v38 = vpop.permute.xlu1 %684 }
 0x166   : > { %v690_v42 = vpop.permute.xlu0 %689 }
 0x168   : > { %v695_v55 = vpop.permute.xlu1 %694 }
 0x16a   : > { %v700_v58 = vpop.permute.xlu0 %699 }
 0x16c   : > { %v705_v8 = vpop.permute.xlu1 %704 }
 0x1cc   : > { %v1477_v13 = vpop.f32.mrb[0].mxu1 }
 0x1cd   : > { %v1006_v16 = vpop.f32.mrb[1].mxu1 }
 0x1ce   : > { %v1478_v18 = vpop.f32.mrb[2].mxu1 }
 0x1cf   : > { %v1395_v10 = vpop.f32.mrb[0].mxu0  ;;  %v1009_v21 = vpop.f32.mrb[3].mxu1 }
 0x1d0   : > { %v1396_v12 = vpop.f32.mrb[1].mxu0 }
 0x1d1   : > { %v1397_v14 = vadd.f32 %v1396_v12, %v1395_v10  ;;  %v1398_v15 = vpop.f32.mrb[2].mxu0 }
 0x1d2   : > { %v1399_v17 = vpop.f32.mrb[3].mxu0 }
 0x1d3   : > { %v1400_v19 = vadd.f32 %v1399_v17, %v1398_v15  ;;  %v910_v20 = vadd.f32 %v1397_v14, %v670_v9  ;;  %v710_v17 = vpop.permute.xlu0 %709 }
 0x1d4   : > { %v1481_v28 = vpop.f32.mrb[4].mxu1 }
 0x1d5   : > { %v913_v22 = vadd.f32 %v1400_v19, %v675_v11  ;;  %v1007_v23 = vadd.f32 %v1006_v16, %v910_v20  ;;  %v1022_v32 = vpop.f32.mrb[5].mxu1 }
 0x1d6   : > { %v1482_v34 = vpop.f32.mrb[6].mxu1 }
 0x1d7   : > { %v1010_v25 = vadd.f32 %v1009_v21, %v913_v22  ;;  %v1401_v26 = vpop.f32.mrb[4].mxu0  ;;  %v1025_v37 = vpop.f32.mrb[7].mxu1 }
 0x1d8   : > { %v1402_v27 = vpop.f32.mrb[5].mxu0  ;;  %v715_v21 = vpop.permute.xlu1 %714 }
 0x1d9   : > { %v1335_v29 = vpack.c.bf16 %v1010_v25, %v1007_v23  ;;  %v1403_v30 = vadd.f32 %v1402_v27, %v1401_v26  ;;  %v1404_v31 = vpop.f32.mrb[6].mxu0 }
 0x1da   : > { %v1405_v33 = vpop.f32.mrb[7].mxu0 }
 0x1db   : > { %1336 = vst [vmem:[%s1611_s26] sm:$0xff] %v1335_v29   ;;  %v918_v35 = vadd.f32 %v1403_v30, %v680_v24  ;;  %v1406_v36 = vadd.f32 %v1405_v33, %v1404_v31  ;;  %v720_v30 = vpop.permute.xlu0 %719 }
 0x1dc   : > { %v1485_v45 = vpop.f32.mrb[8].mxu1 }
 0x1dd   : > { %v1015_v39 = vadd.f32 %v1477_v13, %v918_v35  ;;  %v921_v40 = vadd.f32 %v1406_v36, %v685_v38  ;;  %v1038_v49 = vpop.f32.mrb[9].mxu1 }
 0x1de   : > { %v1486_v51 = vpop.f32.mrb[10].mxu1 }
 0x1df   : > { %v1018_v41 = vadd.f32 %v1478_v18, %v921_v40  ;;  %v1407_v43 = vpop.f32.mrb[8].mxu0  ;;  %v1041_v54 = vpop.f32.mrb[11].mxu1 }
 0x1e0   : > { %v1408_v44 = vpop.f32.mrb[9].mxu0 }
 0x1e1   : > { %v1340_v46 = vpack.c.bf16 %v1018_v41, %v1015_v39  ;;  %v1409_v47 = vadd.f32 %v1408_v44, %v1407_v43  ;;  %v1410_v48 = vpop.f32.mrb[10].mxu0  ;;  %v730_v43 = vpop.permute.xlu0 %729 }
 0x1e2   : > { %v1411_v50 = vpop.f32.mrb[11].mxu0 }
 0x1e3   : > { %1372 = vst [vmem:[%s1611_s26 + $0x8] sm:$0xff] %v1340_v46   ;;  %v1412_v52 = vadd.f32 %v1411_v50, %v1410_v48  ;;  %v926_v53 = vadd.f32 %v1409_v47, %v690_v42 }
 0x1e4   : > { %v1682_v62 = vpop.f32.mrb[12].mxu1 }
 0x1e5   : > { %v1023_v56 = vadd.f32 %v1022_v32, %v926_v53  ;;  %v929_v57 = vadd.f32 %v1412_v52, %v695_v55  ;;  %v1054_v2 = vpop.f32.mrb[13].mxu1 }
 0x1e6   : > { %v1684_v4 = vpop.f32.mrb[14].mxu1 }
 0x1e7   : > { %v1026_v59 = vadd.f32 %v1025_v37, %v929_v57  ;;  %v1413_v60 = vpop.f32.mrb[12].mxu0  ;;  %v1057_v7 = vpop.f32.mrb[15].mxu1 }
 0x1e8   : > { %v1414_v61 = vpop.f32.mrb[13].mxu0 }
 0x1e9   : > { %v1345_v63 = vpack.c.bf16 %v1026_v59, %v1023_v56  ;;  %v1415_v0 = vadd.f32 %v1414_v61, %v1413_v60  ;;  %v1416_v1 = vpop.f32.mrb[14].mxu0  ;;  %v740_v56 = vpop.permute.xlu0 %739 }
 0x1ea   : > { %v1417_v3 = vpop.f32.mrb[15].mxu0 }
 0x1eb   : > { %1373 = vst [vmem:[%s1611_s26 + $0x10] sm:$0xff] %v1345_v63   ;;  %v934_v5 = vadd.f32 %v1415_v0, %v700_v58  ;;  %v1418_v6 = vadd.f32 %v1417_v3, %v1416_v1 }
 0x1ed   : > { %v1031_v9 = vadd.f32 %v1481_v28, %v934_v5  ;;  %v937_v10 = vadd.f32 %v1418_v6, %v705_v8 }
 0x1ef   : > { %v1034_v11 = vadd.f32 %v1482_v34, %v937_v10  ;;  %v1419_v12 = vpop.f32.mrb[16].mxu0  ;;  %v725_v34 = vpop.permute.xlu1 %724 }
 0x1f0   : > { %v1420_v13 = vpop.f32.mrb[17].mxu0 }
 0x1f1   : > { %v1350_v14 = vpack.c.bf16 %v1034_v11, %v1031_v9  ;;  %v1421_v15 = vadd.f32 %v1420_v13, %v1419_v12  ;;  %v1422_v16 = vpop.f32.mrb[18].mxu0 }
 0x1f2   : > { %v1423_v18 = vpop.f32.mrb[19].mxu0 }
 0x1f3   : > { %1374 = vst [vmem:[%s1611_s26 + $0x18] sm:$0xff] %v1350_v14   ;;  %v1424_v19 = vadd.f32 %v1423_v18, %v1422_v16  ;;  %v942_v20 = vadd.f32 %v1421_v15, %v710_v17  ;;  %v735_v48 = vpop.permute.xlu1 %734 }
 0x1f5   : > { %v1039_v22 = vadd.f32 %v1038_v49, %v942_v20  ;;  %v945_v23 = vadd.f32 %v1424_v19, %v715_v21 }
 0x1f7   : > { %v1042_v24 = vadd.f32 %v1041_v54, %v945_v23  ;;  %v1425_v25 = vpop.f32.mrb[20].mxu0  ;;  %v745_v60 = vpop.permute.xlu1 %744 }
 0x1f8   : > { %v1426_v26 = vpop.f32.mrb[21].mxu0 }
 0x1f9   : > { %v1355_v27 = vpack.c.bf16 %v1042_v24, %v1039_v22  ;;  %v1427_v28 = vadd.f32 %v1426_v26, %v1425_v25  ;;  %v1428_v29 = vpop.f32.mrb[22].mxu0 }
 0x1fa   : > { %v1429_v31 = vpop.f32.mrb[23].mxu0 }
 0x1fb   : > { %1375 = vst [vmem:[%s1611_s26 + $0x20] sm:$0xff] %v1355_v27   ;;  %v950_v32 = vadd.f32 %v1427_v28, %v720_v30  ;;  %v1430_v33 = vadd.f32 %v1429_v31, %v1428_v29 }
 0x1fd   : > { %v1047_v35 = vadd.f32 %v1485_v45, %v950_v32  ;;  %v953_v36 = vadd.f32 %v1430_v33, %v725_v34 }
 0x1ff   : > { %v1050_v37 = vadd.f32 %v1486_v51, %v953_v36  ;;  %v1431_v38 = vpop.f32.mrb[24].mxu0 }
 0x200   : > { %v1432_v39 = vpop.f32.mrb[25].mxu0 }
 0x201   : > { %v1360_v40 = vpack.c.bf16 %v1050_v37, %v1047_v35  ;;  %v1433_v41 = vadd.f32 %v1432_v39, %v1431_v38  ;;  %v1434_v42 = vpop.f32.mrb[26].mxu0 }
 0x202   : > { %v1435_v44 = vpop.f32.mrb[27].mxu0 }
 0x203   : > { %1376 = vst [vmem:[%s1611_s26 + $0x28] sm:$0xff] %v1360_v40   ;;  %v1436_v46 = vadd.f32 %v1435_v44, %v1434_v42  ;;  %v958_v47 = vadd.f32 %v1433_v41, %v730_v43 }
 0x205   : > { %v1055_v49 = vadd.f32 %v1054_v2, %v958_v47  ;;  %v961_v50 = vadd.f32 %v1436_v46, %v735_v48 }
 0x207   : > { %v1058_v52 = vadd.f32 %v1057_v7, %v961_v50  ;;  %v1437_v53 = vpop.f32.mrb[28].mxu0 }
 0x208   : > { %v1438_v45 = vpop.f32.mrb[29].mxu0 }
 0x209   : > { %v1365_v54 = vpack.c.bf16 %v1058_v52, %v1055_v49  ;;  %v1439_v51 = vadd.f32 %v1438_v45, %v1437_v53  ;;  %v1440_v55 = vpop.f32.mrb[30].mxu0 }
 0x20a   : > { %v1441_v57 = vpop.f32.mrb[31].mxu0 }
 0x20b   : > { %1377 = vst [vmem:[%s1611_s26 + $0x30] sm:$0xff] %v1365_v54   ;;  %v966_v58 = vadd.f32 %v1439_v51, %v740_v56  ;;  %v1442_v59 = vadd.f32 %v1441_v57, %v1440_v55 }
 0x20d   : > { %v1063_v61 = vadd.f32 %v1682_v62, %v966_v58  ;;  %v969_v63 = vadd.f32 %v1442_v59, %v745_v60 }
 0x20f   : > { %v1066_v0 = vadd.f32 %v1684_v4, %v969_v63 }
 0x211   : > { %v1370_v1 = vpack.c.bf16 %v1066_v0, %v1063_v61 }
 0x213   : > { %1378 = vst [vmem:[%s1611_s26 + $0x38] sm:$0xff] %v1370_v1  }
 0x214 PF: > { %s13_s12 = sadd.s32 1, %s1560_s12  }
 0x215   : > { %p10_p5 = scmp.ge.s32.totalorder %s13_s12, 4  }
 0x217   :  { %12 = sbr.rel (!%p10_p5) target bundleno = 1 (0x1), region = 69 }

// kernel: autoencoder_forward.3
= control target key start
LH: loop header
LB: loop body
LE: loop exit
PB: predicated region body
PF: predicated region fallthrough
CT: control target
= control target key end

     0   :  { %s2589_s16 = smov 7   ;;  %s2590_s21 = smov 3   ;;  %v2591_v6 = vmov 0   ;;  %vm21_vm0 = vcmask 56320   ;;  %s3609_s0 = inlined_call_operand.vmem [shape: bf16[192,128], index: 0, kind: input, shape index: {}]   ;;  %s3610_s1 = inlined_call_operand.vmem [shape: bf16[48,1536], index: 1, kind: input, shape index: {}]   ;;  %s3611_s2 = inlined_call_operand.vmem [shape: f32[48,1], index: 2, kind: input, shape index: {}]   ;;  %s3612_s3 = inlined_call_operand.hbm [shape: f32[48,135], index: 3, kind: output, shape index: {}]  }
   0x1   :  { %v2410_v0 = vld [vmem:[%s3609_s0] sm:$0xff]   ;;  %v2411_v1 = vld [vmem:[%s3609_s0 + $0x8] sm:$0xff]   ;;  %v2638_v4 = vld [vmem:[%s3609_s0 + $0x10] sm:$0xff]   ;;  %20 = vst [vmem:[#allocation2] sm:$0xff] %v2591_v6  ;;  %2408 = vset.pattern.permute.xlu0 %v2591_v6  ;;  %2409 = vset.pattern.permute.xlu1 %v2591_v6  ;;  %s2592_s14 = smov 6   ;;  %s2593_s18 = smov 2  }
   0x2   :  { %297 = vrot.lane.b32.xlu0 %v2410_v0, %s2589_s16  ;;  %v2412_v2 = vld [vmem:[%s3609_s0] sm:$0xff]   ;;  %299 = vrot.lane.b32.xlu1 %v2411_v1, %s2589_s16  ;;  %v2413_v3 = vld [vmem:[%s3609_s0 + $0x8] sm:$0xff]   ;;  %23 = vst [vmem:[#allocation2 + $0x10] sm:$0xff] %v2591_v6  ;;  %25 = vst [vmem:[#allocation2 + $0x20] sm:$0xff] %v2591_v6  ;;  %s2594_s22 = smov 5   ;;  %s2595_s23 = smov 1  }
   0x3   :  { %v2644_v5 = vld [vmem:[%s3609_s0 + $0x10] sm:$0xff]   ;;  %27 = vst [vmem:[#allocation2 + $0x30] sm:$0xff] %v2591_v6  ;;  %29 = vst [vmem:[#allocation2 + $0x40] sm:$0xff] %v2591_v6  ;;  %v2416_v7 = vld [vmem:[%s3609_s0 + $0x18] sm:$0xff]  }
   0x4   :  { %31 = vst [vmem:[#allocation2 + $0x50] sm:$0xff] %v2591_v6  ;;  %33 = vst [vmem:[#allocation2 + $0x60] sm:$0xff] %v2591_v6  ;;  %v2417_v8 = vld [vmem:[%s3609_s0 + $0x18] sm:$0xff]   ;;  %v2418_v9 = vld [vmem:[%s3609_s0 + $0x20] sm:$0xff]  }
   0x5   :  { %35 = vst [vmem:[#allocation2 + $0x70] sm:$0xff] %v2591_v6  ;;  %37 = vst [vmem:[#allocation2 + $0x80] sm:$0xff] %v2591_v6  ;;  %v2419_v10 = vld [vmem:[%s3609_s0 + $0x20] sm:$0xff]   ;;  %v2420_v11 = vld [vmem:[%s3609_s0 + $0x28] sm:$0xff]  }
   0x6   :  { %880 = vrot.lane.b32.xlu0 %v2412_v2, %s2590_s21  ;;  %882 = vrot.lane.b32.xlu1 %v2413_v3, %s2590_s21  ;;  %39 = vst [vmem:[#allocation2 + $0x90] sm:$0xff] %v2591_v6  ;;  %41 = vst [vmem:[#allocation2 + $0xa0] sm:$0xff] %v2591_v6  ;;  %v2421_v12 = vld [vmem:[%s3609_s0 + $0x28] sm:$0xff]   ;;  %v2422_v13 = vld [vmem:[%s3609_s0 + $0x30] sm:$0xff]  }
   0x7   :  { %43 = vst [vmem:[#allocation2 + $0xb0] sm:$0xff] %v2591_v6  ;;  %45 = vst [vmem:[#allocation2 + $0xc0] sm:$0xff] %v2591_v6  ;;  %v2423_v14 = vld [vmem:[%s3609_s0 + $0x30] sm:$0xff]   ;;  %v2424_v15 = vld [vmem:[%s3609_s0 + $0x38] sm:$0xff]  }
   0x8   :  { %47 = vst [vmem:[#allocation2 + $0xd0] sm:$0xff] %v2591_v6  ;;  %49 = vst [vmem:[#allocation2 + $0xe0] sm:$0xff] %v2591_v6  ;;  %v2425_v16 = vld [vmem:[%s3609_s0 + $0x38] sm:$0xff]   ;;  %v2426_v17 = vld [vmem:[%s3609_s0 + $0x40] sm:$0xff]  }
   0x9   :  { %51 = vst [vmem:[#allocation2 + $0xf0] sm:$0xff] %v2591_v6  ;;  %53 = vst [vmem:[#allocation2 + $0x100] sm:$0xff] %v2591_v6  ;;  %v2427_v18 = vld [vmem:[%s3609_s0 + $0x40] sm:$0xff]   ;;  %v2428_v19 = vld [vmem:[%s3609_s0 + $0x48] sm:$0xff]  }
   0xa   :  { %55 = vst [vmem:[#allocation2 + $0x110] sm:$0xff] %v2591_v6  ;;  %57 = vst [vmem:[#allocation2 + $0x120] sm:$0xff] %v2591_v6  ;;  %301 = vrot.lane.b32.xlu0 %v2638_v4, %s2589_s16  ;;  %884 = vrot.lane.b32.xlu1 %v2644_v5, %s2590_s21  ;;  %v2429_v20 = vld [vmem:[%s3609_s0 + $0x48] sm:$0xff]   ;;  %v2430_v21 = vld [vmem:[%s3609_s0 + $0x50] sm:$0xff]  }
   0xb   :  { %59 = vst [vmem:[#allocation2 + $0x130] sm:$0xff] %v2591_v6  ;;  %61 = vst [vmem:[#allocation2 + $0x140] sm:$0xff] %v2591_v6  ;;  %v2431_v22 = vld [vmem:[%s3609_s0 + $0x50] sm:$0xff]   ;;  %v2432_v23 = vld [vmem:[%s3609_s0 + $0x58] sm:$0xff]  }
   0xc   :  { %63 = vst [vmem:[#allocation2 + $0x150] sm:$0xff] %v2591_v6  ;;  %65 = vst [vmem:[#allocation2 + $0x160] sm:$0xff] %v2591_v6  ;;  %v2433_v24 = vld [vmem:[%s3609_s0 + $0x58] sm:$0xff]   ;;  %v2434_v25 = vld [vmem:[%s3609_s0] sm:$0xff]  }
   0xd   :  { %67 = vst [vmem:[#allocation2 + $0x170] sm:$0xff] %v2591_v6  ;;  %69 = vst [vmem:[#allocation2 + $0x180] sm:$0xff] %v2591_v6  ;;  %v2435_v26 = vld [vmem:[%s3609_s0] sm:$0xff]   ;;  %v2436_v27 = vld [vmem:[%s3609_s0 + $0x8] sm:$0xff]  }
   0xe   :  { %71 = vst [vmem:[#allocation2 + $0x190] sm:$0xff] %v2591_v6  ;;  %73 = vst [vmem:[#allocation2 + $0x1a0] sm:$0xff] %v2591_v6  ;;  %303 = vrot.lane.b32.xlu0 %v2416_v7, %s2589_s16  ;;  %886 = vrot.lane.b32.xlu1 %v2417_v8, %s2590_s21  ;;  %v2437_v28 = vld [vmem:[%s3609_s0 + $0x8] sm:$0xff]   ;;  %v2438_v29 = vld [vmem:[%s3609_s0 + $0x10] sm:$0xff]  }
   0xf   :  { %75 = vst [vmem:[#allocation2 + $0x1b0] sm:$0xff] %v2591_v6  ;;  %77 = vst [vmem:[#allocation2 + $0x1c0] sm:$0xff] %v2591_v6  ;;  %v2439_v30 = vld [vmem:[%s3609_s0 + $0x10] sm:$0xff]   ;;  %v2440_v31 = vld [vmem:[%s3609_s0 + $0x18] sm:$0xff]  }
  0x10   :  { %79 = vst [vmem:[#allocation2 + $0x1d0] sm:$0xff] %v2591_v6  ;;  %81 = vst [vmem:[#allocation2 + $0x1e0] sm:$0xff] %v2591_v6  ;;  %v2441_v32 = vld [vmem:[%s3609_s0 + $0x18] sm:$0xff]   ;;  %v2442_v33 = vld [vmem:[%s3609_s0 + $0x20] sm:$0xff]  }
  0x11   :  { %83 = vst [vmem:[#allocation2 + $0x1f0] sm:$0xff] %v2591_v6  ;;  %85 = vst [vmem:[#allocation2 + $0x200] sm:$0xff] %v2591_v6  ;;  %v2443_v34 = vld [vmem:[%s3609_s0 + $0x20] sm:$0xff]   ;;  %v2444_v35 = vld [vmem:[%s3609_s0 + $0x28] sm:$0xff]  }
  0x12   :  { %87 = vst [vmem:[#allocation2 + $0x210] sm:$0xff] %v2591_v6  ;;  %89 = vst [vmem:[#allocation2 + $0x220] sm:$0xff] %v2591_v6  ;;  %305 = vrot.lane.b32.xlu0 %v2418_v9, %s2589_s16  ;;  %888 = vrot.lane.b32.xlu1 %v2419_v10, %s2590_s21  ;;  %v2445_v36 = vld [vmem:[%s3609_s0 + $0x28] sm:$0xff]   ;;  %v2446_v37 = vld [vmem:[%s3609_s0 + $0x30] sm:$0xff]  }
  0x13   :  { %91 = vst [vmem:[#allocation2 + $0x230] sm:$0xff] %v2591_v6  ;;  %93 = vst [vmem:[#allocation2 + $0x240] sm:$0xff] %v2591_v6  ;;  %v2447_v38 = vld [vmem:[%s3609_s0 + $0x30] sm:$0xff]   ;;  %v2448_v39 = vld [vmem:[%s3609_s0 + $0x38] sm:$0xff]  }
  0x14   :  { %95 = vst [vmem:[#allocation2 + $0x250] sm:$0xff] %v2591_v6  ;;  %97 = vst [vmem:[#allocation2 + $0x260] sm:$0xff] %v2591_v6  ;;  %v2449_v40 = vld [vmem:[%s3609_s0 + $0x38] sm:$0xff]   ;;  %v2450_v41 = vld [vmem:[%s3609_s0 + $0x40] sm:$0xff]  }
  0x15   :  { %99 = vst [vmem:[#allocation2 + $0x270] sm:$0xff] %v2591_v6  ;;  %101 = vst [vmem:[#allocation2 + $0x280] sm:$0xff] %v2591_v6  ;;  %v2451_v42 = vld [vmem:[%s3609_s0 + $0x40] sm:$0xff]   ;;  %v2452_v43 = vld [vmem:[%s3609_s0 + $0x48] sm:$0xff]  }
  0x16   :  { %103 = vst [vmem:[#allocation2 + $0x290] sm:$0xff] %v2591_v6  ;;  %105 = vst [vmem:[#allocation2 + $0x2a0] sm:$0xff] %v2591_v6  ;;  %307 = vrot.lane.b32.xlu0 %v2420_v11, %s2589_s16  ;;  %890 = vrot.lane.b32.xlu1 %v2421_v12, %s2590_s21  ;;  %v2453_v44 = vld [vmem:[%s3609_s0 + $0x48] sm:$0xff]   ;;  %v2495_v45 = vld [vmem:[%s3610_s1 + $0x4] ss:$48 sps:$4 sm:$0xff]  }
  0x17   :  { %107 = vst [vmem:[#allocation2 + $0x2b0] sm:$0xff] %v2591_v6  ;;  %109 = vst [vmem:[#allocation2 + $0x2c0] sm:$0xff] %v2591_v6  ;;  %v2454_v46 = vld [vmem:[%s3609_s0 + $0x50] sm:$0xff]   ;;  %1818 = vmatprep.mubr.bf16.mxu1 %v2495_v45  ;;  %v2499_v48 = vld [vmem:[%s3610_s1 + $0x1c] ss:$48 sps:$4 sm:$0xff]  }
  0x18   :  { %111 = vst [vmem:[#allocation2 + $0x2d0] sm:$0xff] %v2591_v6  ;;  %113 = vst [vmem:[#allocation2 + $0x2e0] sm:$0xff] %v2591_v6  ;;  %v2455_v47 = vld [vmem:[%s3609_s0 + $0x50] sm:$0xff]   ;;  %v2456_v49 = vld [vmem:[%s3609_s0 + $0x58] sm:$0xff]   ;;  %2007 = vmatprep.mubr.bf16.mxu0 %v2499_v48 }
  0x19   :  { %115 = vst [vmem:[#allocation2 + $0x2f0] sm:$0xff] %v2591_v6  ;;  %117 = vst [vmem:[#allocation2 + $0x300] sm:$0xff] %v2591_v6  ;;  %v2457_v50 = vld [vmem:[%s3609_s0 + $0x58] sm:$0xff]   ;;  %v2458_v51 = vld [vmem:[%s3609_s0] sm:$0xff]  }
  0x1a   :  { %119 = vst [vmem:[#allocation2 + $0x310] sm:$0xff] %v2591_v6  ;;  %121 = vst [vmem:[#allocation2 + $0x320] sm:$0xff] %v2591_v6  ;;  %309 = vrot.lane.b32.xlu0 %v2422_v13, %s2589_s16  ;;  %892 = vrot.lane.b32.xlu1 %v2423_v14, %s2590_s21  ;;  %v2459_v52 = vld [vmem:[%s3609_s0] sm:$0xff]   ;;  %v2460_v53 = vld [vmem:[%s3609_s0 + $0x8] sm:$0xff]  }
  0x1b   :  { %123 = vst [vmem:[#allocation2 + $0x330] sm:$0xff] %v2591_v6  ;;  %125 = vst [vmem:[#allocation2 + $0x340] sm:$0xff] %v2591_v6  ;;  %v2461_v54 = vld [vmem:[%s3609_s0 + $0x8] sm:$0xff]   ;;  %v2462_v55 = vld [vmem:[%s3609_s0 + $0x10] sm:$0xff]  }
  0x1c   :  { %127 = vst [vmem:[#allocation2 + $0x350] sm:$0xff] %v2591_v6  ;;  %129 = vst [vmem:[#allocation2 + $0x360] sm:$0xff] %v2591_v6  ;;  %v2463_v56 = vld [vmem:[%s3609_s0 + $0x10] sm:$0xff]  }
  0x1d   :  { %131 = vst [vmem:[#allocation2 + $0x370] sm:$0xff] %v2591_v6  ;;  %133 = vst [vmem:[#allocation2 + $0x380] sm:$0xff] %v2591_v6 }
  0x1e   :  { %135 = vst [vmem:[#allocation2 + $0x390] sm:$0xff] %v2591_v6  ;;  %137 = vst [vmem:[#allocation2 + $0x3a0] sm:$0xff] %v2591_v6  ;;  %311 = vrot.lane.b32.xlu0 %v2424_v15, %s2589_s16  ;;  %894 = vrot.lane.b32.xlu1 %v2425_v16, %s2590_s21 }
  0x1f   :  { %139 = vst [vmem:[#allocation2 + $0x3b0] sm:$0xff] %v2591_v6  ;;  %141 = vst [vmem:[#allocation2 + $0x3c0] sm:$0xff] %v2591_v6 }
  0x20   :  { %143 = vst [vmem:[#allocation2 + $0x3d0] sm:$0xff] %v2591_v6  ;;  %145 = vst [vmem:[#allocation2 + $0x3e0] sm:$0xff] %v2591_v6 }
  0x21   :  { %147 = vst [vmem:[#allocation2 + $0x3f0] sm:$0xff] %v2591_v6  ;;  %149 = vst [vmem:[#allocation2 + $0x400] sm:$0xff] %v2591_v6 }
  0x22   :  { %151 = vst [vmem:[#allocation2 + $0x410] sm:$0xff] %v2591_v6  ;;  %153 = vst [vmem:[#allocation2 + $0x420] sm:$0xff] %v2591_v6  ;;  %313 = vrot.lane.b32.xlu0 %v2426_v17, %s2589_s16  ;;  %896 = vrot.lane.b32.xlu1 %v2427_v18, %s2590_s21 }
  0x23   :  { %155 = vst [vmem:[#allocation2 + $0x430] sm:$0xff] %v2591_v6  ;;  %157 = vst [vmem:[#allocation2 + $0x440] sm:$0xff] %v2591_v6 }
  0x24   :  { %159 = vst [vmem:[#allocation2 + $0x450] sm:$0xff] %v2591_v6  ;;  %161 = vst [vmem:[#allocation2 + $0x460] sm:$0xff] %v2591_v6 }
  0x25   :  { %163 = vst [vmem:[#allocation2 + $0x470] sm:$0xff] %v2591_v6  ;;  %165 = vst [vmem:[#allocation2 + $0x480] sm:$0xff] %v2591_v6 }
  0x26   :  { %167 = vst [vmem:[#allocation2 + $0x490] sm:$0xff] %v2591_v6  ;;  %169 = vst [vmem:[#allocation2 + $0x4a0] sm:$0xff] %v2591_v6  ;;  %315 = vrot.lane.b32.xlu0 %v2428_v19, %s2589_s16  ;;  %898 = vrot.lane.b32.xlu1 %v2429_v20, %s2590_s21 }
  0x27   :  { %171 = vst [vmem:[#allocation2 + $0x4b0] sm:$0xff] %v2591_v6  ;;  %173 = vst [vmem:[#allocation2 + $0x4c0] sm:$0xff] %v2591_v6 }
  0x28   :  { %175 = vst [vmem:[#allocation2 + $0x4d0] sm:$0xff] %v2591_v6  ;;  %177 = vst [vmem:[#allocation2 + $0x4e0] sm:$0xff] %v2591_v6 }
  0x29   :  { %179 = vst [vmem:[#allocation2 + $0x4f0] sm:$0xff] %v2591_v6  ;;  %181 = vst [vmem:[#allocation2 + $0x500] sm:$0xff] %v2591_v6 }
  0x2a   :  { %183 = vst [vmem:[#allocation2 + $0x510] sm:$0xff] %v2591_v6  ;;  %185 = vst [vmem:[#allocation2 + $0x520] sm:$0xff] %v2591_v6  ;;  %317 = vrot.lane.b32.xlu0 %v2430_v21, %s2589_s16  ;;  %900 = vrot.lane.b32.xlu1 %v2431_v22, %s2590_s21 }
  0x2b   :  { %187 = vst [vmem:[#allocation2 + $0x530] sm:$0xff] %v2591_v6  ;;  %22 = vst.msk [vmem:[#allocation2 + $0x8] sm:$0xff] %vm21_vm0, %v2591_v6 }
  0x2c   :  { %24 = vst.msk [vmem:[#allocation2 + $0x18] sm:$0xff] %vm21_vm0, %v2591_v6  ;;  %26 = vst.msk [vmem:[#allocation2 + $0x28] sm:$0xff] %vm21_vm0, %v2591_v6 }
  0x2d   :  { %28 = vst.msk [vmem:[#allocation2 + $0x38] sm:$0xff] %vm21_vm0, %v2591_v6  ;;  %30 = vst.msk [vmem:[#allocation2 + $0x48] sm:$0xff] %vm21_vm0, %v2591_v6 }
  0x2e   :  { %32 = vst.msk [vmem:[#allocation2 + $0x58] sm:$0xff] %vm21_vm0, %v2591_v6  ;;  %34 = vst.msk [vmem:[#allocation2 + $0x68] sm:$0xff] %vm21_vm0, %v2591_v6  ;;  %319 = vrot.lane.b32.xlu0 %v2432_v23, %s2589_s16  ;;  %902 = vrot.lane.b32.xlu1 %v2433_v24, %s2590_s21 }
  0x2f   :  { %36 = vst.msk [vmem:[#allocation2 + $0x78] sm:$0xff] %vm21_vm0, %v2591_v6  ;;  %38 = vst.msk [vmem:[#allocation2 + $0x88] sm:$0xff] %vm21_vm0, %v2591_v6 }
  0x30   :  { %40 = vst.msk [vmem:[#allocation2 + $0x98] sm:$0xff] %vm21_vm0, %v2591_v6  ;;  %42 = vst.msk [vmem:[#allocation2 + $0xa8] sm:$0xff] %vm21_vm0, %v2591_v6 }
  0x31   :  { %44 = vst.msk [vmem:[#allocation2 + $0xb8] sm:$0xff] %vm21_vm0, %v2591_v6  ;;  %46 = vst.msk [vmem:[#allocation2 + $0xc8] sm:$0xff] %vm21_vm0, %v2591_v6 }
  0x32   :  { %48 = vst.msk [vmem:[#allocation2 + $0xd8] sm:$0xff] %vm21_vm0, %v2591_v6  ;;  %50 = vst.msk [vmem:[#allocation2 + $0xe8] sm:$0xff] %vm21_vm0, %v2591_v6  ;;  %442 = vrot.lane.b32.xlu0 %v2434_v25, %s2592_s14  ;;  %1026 = vrot.lane.b32.xlu1 %v2435_v26, %s2593_s18 }
  0x33   :  { %52 = vst.msk [vmem:[#allocation2 + $0xf8] sm:$0xff] %vm21_vm0, %v2591_v6  ;;  %54 = vst.msk [vmem:[#allocation2 + $0x108] sm:$0xff] %vm21_vm0, %v2591_v6 }
  0x34   :  { %56 = vst.msk [vmem:[#allocation2 + $0x118] sm:$0xff] %vm21_vm0, %v2591_v6  ;;  %58 = vst.msk [vmem:[#allocation2 + $0x128] sm:$0xff] %vm21_vm0, %v2591_v6 }
  0x35   :  { %60 = vst.msk [vmem:[#allocation2 + $0x138] sm:$0xff] %vm21_vm0, %v2591_v6  ;;  %62 = vst.msk [vmem:[#allocation2 + $0x148] sm:$0xff] %vm21_vm0, %v2591_v6 }
  0x36   :  { %64 = vst.msk [vmem:[#allocation2 + $0x158] sm:$0xff] %vm21_vm0, %v2591_v6  ;;  %66 = vst.msk [vmem:[#allocation2 + $0x168] sm:$0xff] %vm21_vm0, %v2591_v6  ;;  %444 = vrot.lane.b32.xlu0 %v2436_v27, %s2592_s14  ;;  %1028 = vrot.lane.b32.xlu1 %v2437_v28, %s2593_s18 }
  0x37   :  { %68 = vst.msk [vmem:[#allocation2 + $0x178] sm:$0xff] %vm21_vm0, %v2591_v6  ;;  %70 = vst.msk [vmem:[#allocation2 + $0x188] sm:$0xff] %vm21_vm0, %v2591_v6 }
  0x38   :  { %72 = vst.msk [vmem:[#allocation2 + $0x198] sm:$0xff] %vm21_vm0, %v2591_v6  ;;  %74 = vst.msk [vmem:[#allocation2 + $0x1a8] sm:$0xff] %vm21_vm0, %v2591_v6 }
  0x39   :  { %76 = vst.msk [vmem:[#allocation2 + $0x1b8] sm:$0xff] %vm21_vm0, %v2591_v6  ;;  %78 = vst.msk [vmem:[#allocation2 + $0x1c8] sm:$0xff] %vm21_vm0, %v2591_v6 }
  0x3a   :  { %80 = vst.msk [vmem:[#allocation2 + $0x1d8] sm:$0xff] %vm21_vm0, %v2591_v6  ;;  %82 = vst.msk [vmem:[#allocation2 + $0x1e8] sm:$0xff] %vm21_vm0, %v2591_v6  ;;  %446 = vrot.lane.b32.xlu0 %v2438_v29, %s2592_s14  ;;  %1030 = vrot.lane.b32.xlu1 %v2439_v30, %s2593_s18 }
  0x3b   :  { %84 = vst.msk [vmem:[#allocation2 + $0x1f8] sm:$0xff] %vm21_vm0, %v2591_v6  ;;  %86 = vst.msk [vmem:[#allocation2 + $0x208] sm:$0xff] %vm21_vm0, %v2591_v6 }
  0x3c   :  { %88 = vst.msk [vmem:[#allocation2 + $0x218] sm:$0xff] %vm21_vm0, %v2591_v6  ;;  %90 = vst.msk [vmem:[#allocation2 + $0x228] sm:$0xff] %vm21_vm0, %v2591_v6 }
  0x3d   :  { %92 = vst.msk [vmem:[#allocation2 + $0x238] sm:$0xff] %vm21_vm0, %v2591_v6  ;;  %94 = vst.msk [vmem:[#allocation2 + $0x248] sm:$0xff] %vm21_vm0, %v2591_v6 }
  0x3e   :  { %96 = vst.msk [vmem:[#allocation2 + $0x258] sm:$0xff] %vm21_vm0, %v2591_v6  ;;  %98 = vst.msk [vmem:[#allocation2 + $0x268] sm:$0xff] %vm21_vm0, %v2591_v6  ;;  %448 = vrot.lane.b32.xlu0 %v2440_v31, %s2592_s14  ;;  %1032 = vrot.lane.b32.xlu1 %v2441_v32, %s2593_s18 }
  0x3f   :  { %100 = vst.msk [vmem:[#allocation2 + $0x278] sm:$0xff] %vm21_vm0, %v2591_v6  ;;  %102 = vst.msk [vmem:[#allocation2 + $0x288] sm:$0xff] %vm21_vm0, %v2591_v6 }
  0x40   :  { %104 = vst.msk [vmem:[#allocation2 + $0x298] sm:$0xff] %vm21_vm0, %v2591_v6  ;;  %106 = vst.msk [vmem:[#allocation2 + $0x2a8] sm:$0xff] %vm21_vm0, %v2591_v6 }
  0x41   :  { %108 = vst.msk [vmem:[#allocation2 + $0x2b8] sm:$0xff] %vm21_vm0, %v2591_v6  ;;  %110 = vst.msk [vmem:[#allocation2 + $0x2c8] sm:$0xff] %vm21_vm0, %v2591_v6 }
  0x42   :  { %112 = vst.msk [vmem:[#allocation2 + $0x2d8] sm:$0xff] %vm21_vm0, %v2591_v6  ;;  %114 = vst.msk [vmem:[#allocation2 + $0x2e8] sm:$0xff] %vm21_vm0, %v2591_v6  ;;  %450 = vrot.lane.b32.xlu0 %v2442_v33, %s2592_s14  ;;  %1034 = vrot.lane.b32.xlu1 %v2443_v34, %s2593_s18 }
  0x43   :  { %116 = vst.msk [vmem:[#allocation2 + $0x2f8] sm:$0xff] %vm21_vm0, %v2591_v6  ;;  %118 = vst.msk [vmem:[#allocation2 + $0x308] sm:$0xff] %vm21_vm0, %v2591_v6 }
  0x44   :  { %120 = vst.msk [vmem:[#allocation2 + $0x318] sm:$0xff] %vm21_vm0, %v2591_v6  ;;  %122 = vst.msk [vmem:[#allocation2 + $0x328] sm:$0xff] %vm21_vm0, %v2591_v6 }
  0x45   :  { %124 = vst.msk [vmem:[#allocation2 + $0x338] sm:$0xff] %vm21_vm0, %v2591_v6  ;;  %126 = vst.msk [vmem:[#allocation2 + $0x348] sm:$0xff] %vm21_vm0, %v2591_v6 }
  0x46   :  { %128 = vst.msk [vmem:[#allocation2 + $0x358] sm:$0xff] %vm21_vm0, %v2591_v6  ;;  %130 = vst.msk [vmem:[#allocation2 + $0x368] sm:$0xff] %vm21_vm0, %v2591_v6  ;;  %452 = vrot.lane.b32.xlu0 %v2444_v35, %s2592_s14  ;;  %1036 = vrot.lane.b32.xlu1 %v2445_v36, %s2593_s18 }
  0x47   :  { %132 = vst.msk [vmem:[#allocation2 + $0x378] sm:$0xff] %vm21_vm0, %v2591_v6  ;;  %134 = vst.msk [vmem:[#allocation2 + $0x388] sm:$0xff] %vm21_vm0, %v2591_v6 }
  0x48   :  { %136 = vst.msk [vmem:[#allocation2 + $0x398] sm:$0xff] %vm21_vm0, %v2591_v6  ;;  %138 = vst.msk [vmem:[#allocation2 + $0x3a8] sm:$0xff] %vm21_vm0, %v2591_v6 }
  0x49   :  { %140 = vst.msk [vmem:[#allocation2 + $0x3b8] sm:$0xff] %vm21_vm0, %v2591_v6  ;;  %142 = vst.msk [vmem:[#allocation2 + $0x3c8] sm:$0xff] %vm21_vm0, %v2591_v6 }
  0x4a   :  { %144 = vst.msk [vmem:[#allocation2 + $0x3d8] sm:$0xff] %vm21_vm0, %v2591_v6  ;;  %146 = vst.msk [vmem:[#allocation2 + $0x3e8] sm:$0xff] %vm21_vm0, %v2591_v6  ;;  %454 = vrot.lane.b32.xlu0 %v2446_v37, %s2592_s14  ;;  %1038 = vrot.lane.b32.xlu1 %v2447_v38, %s2593_s18 }
  0x4b   :  { %148 = vst.msk [vmem:[#allocation2 + $0x3f8] sm:$0xff] %vm21_vm0, %v2591_v6  ;;  %150 = vst.msk [vmem:[#allocation2 + $0x408] sm:$0xff] %vm21_vm0, %v2591_v6 }
  0x4c   :  { %152 = vst.msk [vmem:[#allocation2 + $0x418] sm:$0xff] %vm21_vm0, %v2591_v6  ;;  %154 = vst.msk [vmem:[#allocation2 + $0x428] sm:$0xff] %vm21_vm0, %v2591_v6 }
  0x4d   :  { %156 = vst.msk [vmem:[#allocation2 + $0x438] sm:$0xff] %vm21_vm0, %v2591_v6  ;;  %158 = vst.msk [vmem:[#allocation2 + $0x448] sm:$0xff] %vm21_vm0, %v2591_v6 }
  0x4e   :  { %160 = vst.msk [vmem:[#allocation2 + $0x458] sm:$0xff] %vm21_vm0, %v2591_v6  ;;  %162 = vst.msk [vmem:[#allocation2 + $0x468] sm:$0xff] %vm21_vm0, %v2591_v6  ;;  %456 = vrot.lane.b32.xlu0 %v2448_v39, %s2592_s14  ;;  %1040 = vrot.lane.b32.xlu1 %v2449_v40, %s2593_s18 }
  0x4f   :  { %164 = vst.msk [vmem:[#allocation2 + $0x478] sm:$0xff] %vm21_vm0, %v2591_v6  ;;  %166 = vst.msk [vmem:[#allocation2 + $0x488] sm:$0xff] %vm21_vm0, %v2591_v6 }
  0x50   :  { %168 = vst.msk [vmem:[#allocation2 + $0x498] sm:$0xff] %vm21_vm0, %v2591_v6  ;;  %170 = vst.msk [vmem:[#allocation2 + $0x4a8] sm:$0xff] %vm21_vm0, %v2591_v6 }
  0x51   :  { %172 = vst.msk [vmem:[#allocation2 + $0x4b8] sm:$0xff] %vm21_vm0, %v2591_v6  ;;  %174 = vst.msk [vmem:[#allocation2 + $0x4c8] sm:$0xff] %vm21_vm0, %v2591_v6 }
  0x52   :  { %176 = vst.msk [vmem:[#allocation2 + $0x4d8] sm:$0xff] %vm21_vm0, %v2591_v6  ;;  %178 = vst.msk [vmem:[#allocation2 + $0x4e8] sm:$0xff] %vm21_vm0, %v2591_v6  ;;  %458 = vrot.lane.b32.xlu0 %v2450_v41, %s2592_s14  ;;  %1042 = vrot.lane.b32.xlu1 %v2451_v42, %s2593_s18 }
  0x53   :  { %180 = vst.msk [vmem:[#allocation2 + $0x4f8] sm:$0xff] %vm21_vm0, %v2591_v6  ;;  %182 = vst.msk [vmem:[#allocation2 + $0x508] sm:$0xff] %vm21_vm0, %v2591_v6 }
  0x54   :  { %184 = vst.msk [vmem:[#allocation2 + $0x518] sm:$0xff] %vm21_vm0, %v2591_v6  ;;  %186 = vst.msk [vmem:[#allocation2 + $0x528] sm:$0xff] %vm21_vm0, %v2591_v6 }
  0x55   :  { %188 = vst.msk [vmem:[#allocation2 + $0x538] sm:$0xff] %vm21_vm0, %v2591_v6  ;;  %190 = vst.msk [vmem:[#allocation2 + $0x548] sm:$0xff] %vm21_vm0, %v2591_v6 }
  0x56   :  { %192 = vst.msk [vmem:[#allocation2 + $0x558] sm:$0xff] %vm21_vm0, %v2591_v6  ;;  %194 = vst.msk [vmem:[#allocation2 + $0x568] sm:$0xff] %vm21_vm0, %v2591_v6  ;;  %460 = vrot.lane.b32.xlu0 %v2452_v43, %s2592_s14  ;;  %1044 = vrot.lane.b32.xlu1 %v2453_v44, %s2593_s18 }
  0x57   :  { %196 = vst.msk [vmem:[#allocation2 + $0x578] sm:$0xff] %vm21_vm0, %v2591_v6  ;;  %198 = vst.msk [vmem:[#allocation2 + $0x588] sm:$0xff] %vm21_vm0, %v2591_v6 }
  0x58   :  { %200 = vst.msk [vmem:[#allocation2 + $0x598] sm:$0xff] %vm21_vm0, %v2591_v6  ;;  %202 = vst.msk [vmem:[#allocation2 + $0x5a8] sm:$0xff] %vm21_vm0, %v2591_v6 }
  0x59   :  { %204 = vst.msk [vmem:[#allocation2 + $0x5b8] sm:$0xff] %vm21_vm0, %v2591_v6  ;;  %206 = vst.msk [vmem:[#allocation2 + $0x5c8] sm:$0xff] %vm21_vm0, %v2591_v6 }
  0x5a   :  { %208 = vst.msk [vmem:[#allocation2 + $0x5d8] sm:$0xff] %vm21_vm0, %v2591_v6  ;;  %210 = vst.msk [vmem:[#allocation2 + $0x5e8] sm:$0xff] %vm21_vm0, %v2591_v6  ;;  %462 = vrot.lane.b32.xlu0 %v2454_v46, %s2592_s14  ;;  %1046 = vrot.lane.b32.xlu1 %v2455_v47, %s2593_s18 }
  0x5b   :  { %212 = vst.msk [vmem:[#allocation2 + $0x5f8] sm:$0xff] %vm21_vm0, %v2591_v6 }
  0x5e   :  { %464 = vrot.lane.b32.xlu0 %v2456_v49, %s2592_s14  ;;  %1048 = vrot.lane.b32.xlu1 %v2457_v50, %s2593_s18 }
  0x62   :  { %588 = vrot.lane.b32.xlu0 %v2458_v51, %s2594_s22  ;;  %1172 = vrot.lane.b32.xlu1 %v2459_v52, %s2595_s23 }
  0x66   :  { %590 = vrot.lane.b32.xlu0 %v2460_v53, %s2594_s22  ;;  %1174 = vrot.lane.b32.xlu1 %v2461_v54, %s2595_s23 }
  0x67   :  { %8 = vsyncpa [#allocation4], 0  ;;  %v2464_v57 = vld [vmem:[%s3609_s0 + $0x18] sm:$0xff]   ;;  %v2466_v59 = vld [vmem:[%s3609_s0 + $0x20] sm:$0xff]   ;;  %vm333_vm1 = vcmask 1047608   ;;  %vm916_vm2 = vcmask 1047576  }
  0x68   :  { %v2465_v58 = vld [vmem:[%s3609_s0 + $0x18] sm:$0xff]   ;;  %v2467_v60 = vld [vmem:[%s3609_s0 + $0x20] sm:$0xff]   ;;  %v2468_v61 = vld [vmem:[%s3609_s0 + $0x28] sm:$0xff]   ;;  %vm918_vm3 = vcmask 23552   ;;  %vm478_vm4 = vcmask 1047600   ;;  %vm480_vm5 = vcmask 48128  }
  0x69   :  { %v2469_v62 = vld [vmem:[%s3609_s0 + $0x28] sm:$0xff]   ;;  %v2470_v1 = vld [vmem:[%s3609_s0 + $0x30] sm:$0xff]   ;;  %v2472_v5 = vld [vmem:[%s3609_s0 + $0x38] sm:$0xff]   ;;  %vm1062_vm6 = vcmask 1047568   ;;  %vm1064_vm7 = vcmask 15360   ;;  %vm624_vm8 = vcmask 1047592  }
  0x6a   :  { %592 = vrot.lane.b32.xlu0 %v2462_v55, %s2594_s22  ;;  %1176 = vrot.lane.b32.xlu1 %v2463_v56, %s2595_s23  ;;  %v2471_v2 = vld [vmem:[%s3609_s0 + $0x30] sm:$0xff]   ;;  %v2473_v6 = vld [vmem:[%s3609_s0 + $0x38] sm:$0xff]   ;;  %vm626_vm9 = vcmask 39936   ;;  %vm1208_vm10 = vcmask 1047560   ;;  %vm1210_vm11 = vcmask 7168   ;;  %vm770_vm12 = vcmask 1047584  }
  0x6b   :  { %v2474_v12 = vld [vmem:[%s3609_s0 + $0x40] sm:$0xff]   ;;  %v2476_v20 = vld [vmem:[%s3609_s0 + $0x48] sm:$0xff]   ;;  %v2478_v28 = vld [vmem:[%s3609_s0 + $0x50] sm:$0xff]   ;;  %vm772_vm13 = vcmask 31744  }
  0x6c   :  { %v2475_v14 = vld [vmem:[%s3609_s0 + $0x40] sm:$0xff]   ;;  %v2477_v21 = vld [vmem:[%s3609_s0 + $0x48] sm:$0xff]   ;;  %v2479_v29 = vld [vmem:[%s3609_s0 + $0x50] sm:$0xff]  }
  0x6d   :  { %v2480_v36 = vld [vmem:[%s3609_s0 + $0x58] sm:$0xff]   ;;  %v2482_v44 = vld [vmem:[%s3609_s0] sm:$0xff]   ;;  %v2483_v45 = vld [vmem:[%s3609_s0 + $0x8] sm:$0xff]  }
  0x6e   :  { %594 = vrot.lane.b32.xlu0 %v2464_v57, %s2594_s22  ;;  %1178 = vrot.lane.b32.xlu1 %v2465_v58, %s2595_s23  ;;  %v2481_v37 = vld [vmem:[%s3609_s0 + $0x58] sm:$0xff]   ;;  %v2518_v52 = vld [vmem:[%s3609_s0] sm:$0xff]  }
  0x6f   :  { %v2484_v53 = vld [vmem:[%s3609_s0 + $0x10] sm:$0xff]   ;;  %v2485_v54 = vld [vmem:[%s3609_s0 + $0x18] sm:$0xff]   ;;  %1330 = vst [vmem:[#allocation2 + $0x540] sm:$0xff] %v2518_v52 }
  0x72   :  { %596 = vrot.lane.b32.xlu0 %v2466_v59, %s2594_s22  ;;  %1180 = vrot.lane.b32.xlu1 %v2467_v60, %s2595_s23 }
  0x74   :  { %v298_v63 = vpop.permute.xlu0 %297  ;;  %v300_v0 = vpop.permute.xlu1 %299 }
  0x75   :  { %334 = vst.msk [vmem:[#allocation2] sm:$0xff] %vm333_vm1, %v298_v63  ;;  %336 = vst.msk [vmem:[#allocation2 + $0x10] sm:$0xff] %vm333_vm1, %v300_v0 }
  0x76   :  { %335 = vst.msk [vmem:[#allocation2 + $0x8] sm:$0xff] %vm21_vm0, %v298_v63  ;;  %598 = vrot.lane.b32.xlu0 %v2468_v61, %s2594_s22  ;;  %337 = vst.msk [vmem:[#allocation2 + $0x18] sm:$0xff] %vm21_vm0, %v300_v0  ;;  %1182 = vrot.lane.b32.xlu1 %v2469_v62, %s2595_s23  ;;  %v2519_v61 = vld [vmem:[%s3609_s0 + $0x8] sm:$0xff]   ;;  %v2486_v62 = vld [vmem:[%s3609_s0 + $0x20] sm:$0xff]  }
  0x77   :  { %v2487_v63 = vld [vmem:[%s3609_s0 + $0x28] sm:$0xff]   ;;  %1331 = vst [vmem:[#allocation2 + $0x550] sm:$0xff] %v2519_v61 }
  0x78   :  { %v881_v3 = vpop.permute.xlu0 %880  ;;  %v883_v4 = vpop.permute.xlu1 %882  ;;  %v3350_v61 = vld [vmem:[%s3609_s0 + $0x48] sm:$0xff]  }
  0x79   :  { %917 = vst.msk [vmem:[#allocation2 + $0x300] sm:$0xff] %vm916_vm2, %v881_v3  ;;  %920 = vst.msk [vmem:[#allocation2 + $0x310] sm:$0xff] %vm916_vm2, %v883_v4 }
  0x7a   :  { %919 = vst.msk [vmem:[#allocation2 + $0x308] sm:$0xff] %vm918_vm3, %v881_v3  ;;  %600 = vrot.lane.b32.xlu0 %v2470_v1, %s2594_s22  ;;  %921 = vst.msk [vmem:[#allocation2 + $0x318] sm:$0xff] %vm918_vm3, %v883_v4  ;;  %1184 = vrot.lane.b32.xlu1 %v2471_v2, %s2595_s23 }
  0x7c   :  { %v302_v7 = vpop.permute.xlu0 %301  ;;  %v1378_v9 = vld [vmem:[#allocation2] sm:$0xff]  ;;  %v885_v10 = vpop.permute.xlu1 %884  ;;  %v1380_v13 = vld [vmem:[#allocation2 + $0x10] sm:$0xff] }
  0x7d   :  { %v1379_v8 = vld [vmem:[#allocation2 + $0x8] sm:$0xff]  ;;  %338 = vst.msk [vmem:[#allocation2 + $0x20] sm:$0xff] %vm333_vm1, %v302_v7  ;;  %v1381_v11 = vld [vmem:[#allocation2 + $0x18] sm:$0xff] }
  0x7e   :  { %339 = vst.msk [vmem:[#allocation2 + $0x28] sm:$0xff] %vm21_vm0, %v302_v7  ;;  %1786 = vmatprep.subr.bf16.mxu1 %v1379_v8  ;;  %602 = vrot.lane.b32.xlu0 %v2472_v5, %s2594_s22  ;;  %v2488_v7 = vld [vmem:[%s3609_s0 + $0x30] sm:$0xff]   ;;  %v2489_v8 = vld [vmem:[%s3609_s0 + $0x38] sm:$0xff]  }
  0x7f   :  { %1787 = vmatpush1.bf16.msra.mxu1 %v1378_v9  ;;  %922 = vst.msk [vmem:[#allocation2 + $0x320] sm:$0xff] %vm916_vm2, %v885_v10  ;;  %1186 = vrot.lane.b32.xlu1 %v2473_v6, %s2595_s23  ;;  %v2520_v6 = vld [vmem:[%s3609_s0 + $0x10] sm:$0xff]  }
  0x80   :  { %923 = vst.msk [vmem:[#allocation2 + $0x328] sm:$0xff] %vm918_vm3, %v885_v10  ;;  %1788 = vmatprep.subr.bf16.mxu1 %v1381_v11  ;;  %v304_v15 = vpop.permute.xlu0 %303  ;;  %v1474_v17 = vld [vmem:[#allocation2 + $0x300] sm:$0xff]  ;;  %v887_v18 = vpop.permute.xlu1 %886  ;;  %v1476_v25 = vld [vmem:[#allocation2 + $0x310] sm:$0xff]  ;;  %1332 = vst [vmem:[#allocation2 + $0x560] sm:$0xff] %v2520_v6 }
  0x81   :  { %v1475_v16 = vld [vmem:[#allocation2 + $0x308] sm:$0xff]  ;;  %340 = vst.msk [vmem:[#allocation2 + $0x30] sm:$0xff] %vm333_vm1, %v304_v15  ;;  %v1477_v19 = vld [vmem:[#allocation2 + $0x318] sm:$0xff]  ;;  %v2500_v6 = vld [vmem:[%s3610_s1 + $0x64] ss:$48 sps:$4 sm:$0xff]  }
  0x82   :  { %341 = vst.msk [vmem:[#allocation2 + $0x38] sm:$0xff] %vm21_vm0, %v304_v15  ;;  %1975 = vmatprep.subr.bf16.mxu0 %v1475_v16  ;;  %604 = vrot.lane.b32.xlu0 %v2474_v12, %s2594_s22  ;;  %v2521_v15 = vld [vmem:[%s3609_s0 + $0x18] sm:$0xff]   ;;  %v2490_v16 = vld [vmem:[%s3609_s0 + $0x40] sm:$0xff]  }
  0x83   :  { %1789 = vmatpush1.bf16.msra.mxu1 %v1380_v13  ;;  %924 = vst.msk [vmem:[#allocation2 + $0x330] sm:$0xff] %vm916_vm2, %v887_v18  ;;  %1976 = vmatpush1.bf16.msra.mxu0 %v1474_v17  ;;  %v2491_v17 = vld [vmem:[%s3609_s0 + $0x48] sm:$0xff]   ;;  %1333 = vst [vmem:[#allocation2 + $0x570] sm:$0xff] %v2521_v15 }
  0x84   :  { %925 = vst.msk [vmem:[#allocation2 + $0x338] sm:$0xff] %vm918_vm3, %v887_v18  ;;  %1188 = vrot.lane.b32.xlu1 %v2475_v14, %s2595_s23  ;;  %v306_v22 = vpop.permute.xlu0 %305  ;;  %1977 = vmatprep.subr.bf16.mxu0 %v1477_v19  ;;  %v1382_v24 = vld [vmem:[#allocation2 + $0x20] sm:$0xff]  ;;  %v889_v26 = vpop.permute.xlu1 %888  ;;  %v2503_v15 = vld [vmem:[%s3610_s1 + $0x7c] ss:$48 sps:$4 sm:$0xff]  }
  0x85   :  { %v1383_v23 = vld [vmem:[#allocation2 + $0x28] sm:$0xff]  ;;  %342 = vst.msk [vmem:[#allocation2 + $0x40] sm:$0xff] %vm333_vm1, %v306_v22 }
  0x86   :  { %343 = vst.msk [vmem:[#allocation2 + $0x48] sm:$0xff] %vm21_vm0, %v306_v22  ;;  %1790 = vmatprep.subr.bf16.mxu1 %v1383_v23  ;;  %606 = vrot.lane.b32.xlu0 %v2476_v20, %s2594_s22  ;;  %v1478_v33 = vld [vmem:[#allocation2 + $0x320] sm:$0xff] }
  0x87   :  { %v1479_v27 = vld [vmem:[#allocation2 + $0x328] sm:$0xff]  ;;  %1791 = vmatpush1.bf16.msra.mxu1 %v1382_v24  ;;  %926 = vst.msk [vmem:[#allocation2 + $0x340] sm:$0xff] %vm916_vm2, %v889_v26  ;;  %1978 = vmatpush1.bf16.msra.mxu0 %v1476_v25  ;;  %v2522_v24 = vld [vmem:[%s3609_s0 + $0x20] sm:$0xff]   ;;  %v2492_v25 = vld [vmem:[%s3609_s0 + $0x50] sm:$0xff]  }
  0x88   :  { %927 = vst.msk [vmem:[#allocation2 + $0x348] sm:$0xff] %vm918_vm3, %v889_v26  ;;  %1190 = vrot.lane.b32.xlu1 %v2477_v21, %s2595_s23  ;;  %v308_v30 = vpop.permute.xlu0 %307  ;;  %1979 = vmatprep.subr.bf16.mxu0 %v1479_v27  ;;  %v1384_v32 = vld [vmem:[#allocation2 + $0x30] sm:$0xff]  ;;  %v891_v34 = vpop.permute.xlu1 %890  ;;  %v2496_v26 = vld [vmem:[%s3609_s0 + $0x58] sm:$0xff]   ;;  %1334 = vst [vmem:[#allocation2 + $0x580] sm:$0xff] %v2522_v24 }
  0x89   :  { %v1385_v31 = vld [vmem:[#allocation2 + $0x38] sm:$0xff]  ;;  %344 = vst.msk [vmem:[#allocation2 + $0x50] sm:$0xff] %vm333_vm1, %v308_v30 }
  0x8a   :  { %345 = vst.msk [vmem:[#allocation2 + $0x58] sm:$0xff] %vm21_vm0, %v308_v30  ;;  %1792 = vmatprep.subr.bf16.mxu1 %v1385_v31  ;;  %608 = vrot.lane.b32.xlu0 %v2478_v28, %s2594_s22  ;;  %v1480_v41 = vld [vmem:[#allocation2 + $0x330] sm:$0xff] }
  0x8b   :  { %v1481_v35 = vld [vmem:[#allocation2 + $0x338] sm:$0xff]  ;;  %1793 = vmatpush1.bf16.msra.mxu1 %v1384_v32  ;;  %928 = vst.msk [vmem:[#allocation2 + $0x350] sm:$0xff] %vm916_vm2, %v891_v34  ;;  %1980 = vmatpush1.bf16.msra.mxu0 %v1478_v33  ;;  %v3312_v33 = vld [vmem:[%s3609_s0 + $0x28] sm:$0xff]  }
  0x8c   :  { %929 = vst.msk [vmem:[#allocation2 + $0x358] sm:$0xff] %vm918_vm3, %v891_v34  ;;  %1192 = vrot.lane.b32.xlu1 %v2479_v29, %s2595_s23  ;;  %v310_v38 = vpop.permute.xlu0 %309  ;;  %1981 = vmatprep.subr.bf16.mxu0 %v1481_v35  ;;  %v1386_v40 = vld [vmem:[#allocation2 + $0x40] sm:$0xff]  ;;  %v893_v42 = vpop.permute.xlu1 %892 }
  0x8d   :  { %v1387_v39 = vld [vmem:[#allocation2 + $0x48] sm:$0xff]  ;;  %346 = vst.msk [vmem:[#allocation2 + $0x60] sm:$0xff] %vm333_vm1, %v310_v38 }
  0x8e   :  { %347 = vst.msk [vmem:[#allocation2 + $0x68] sm:$0xff] %vm21_vm0, %v310_v38  ;;  %1794 = vmatprep.subr.bf16.mxu1 %v1387_v39  ;;  %610 = vrot.lane.b32.xlu0 %v2480_v36, %s2594_s22  ;;  %v1482_v49 = vld [vmem:[#allocation2 + $0x340] sm:$0xff] }
  0x8f   :  { %v1483_v43 = vld [vmem:[#allocation2 + $0x348] sm:$0xff]  ;;  %1795 = vmatpush1.bf16.msra.mxu1 %v1386_v40  ;;  %930 = vst.msk [vmem:[#allocation2 + $0x360] sm:$0xff] %vm916_vm2, %v893_v42  ;;  %1982 = vmatpush1.bf16.msra.mxu0 %v1480_v41  ;;  %v3323_v40 = vld [vmem:[%s3609_s0 + $0x30] sm:$0xff]  }
  0x90   :  { %931 = vst.msk [vmem:[#allocation2 + $0x368] sm:$0xff] %vm918_vm3, %v893_v42  ;;  %1194 = vrot.lane.b32.xlu1 %v2481_v37, %s2595_s23  ;;  %v312_v46 = vpop.permute.xlu0 %311  ;;  %1983 = vmatprep.subr.bf16.mxu0 %v1483_v43  ;;  %v1388_v48 = vld [vmem:[#allocation2 + $0x50] sm:$0xff]  ;;  %v895_v50 = vpop.permute.xlu1 %894  ;;  %s2596_s23 = smov 4  }
  0x91   :  { %v1389_v47 = vld [vmem:[#allocation2 + $0x58] sm:$0xff]  ;;  %348 = vst.msk [vmem:[#allocation2 + $0x70] sm:$0xff] %vm333_vm1, %v312_v46 }
  0x92   :  { %349 = vst.msk [vmem:[#allocation2 + $0x78] sm:$0xff] %vm21_vm0, %v312_v46  ;;  %1796 = vmatprep.subr.bf16.mxu1 %v1389_v47  ;;  %734 = vrot.lane.b32.xlu0 %v2482_v44, %s2596_s23  ;;  %v1484_v58 = vld [vmem:[#allocation2 + $0x350] sm:$0xff]  ;;  %v3332_v47 = vld [vmem:[%s3609_s0 + $0x38] sm:$0xff]  }
  0x93   :  { %v1485_v51 = vld [vmem:[#allocation2 + $0x358] sm:$0xff]  ;;  %1797 = vmatpush1.bf16.msra.mxu1 %v1388_v48  ;;  %932 = vst.msk [vmem:[#allocation2 + $0x370] sm:$0xff] %vm916_vm2, %v895_v50  ;;  %1984 = vmatpush1.bf16.msra.mxu0 %v1482_v49 }
  0x94   :  { %933 = vst.msk [vmem:[#allocation2 + $0x378] sm:$0xff] %vm918_vm3, %v895_v50  ;;  %736 = vrot.lane.b32.xlu1 %v2483_v45, %s2596_s23  ;;  %v314_v55 = vpop.permute.xlu0 %313  ;;  %1985 = vmatprep.subr.bf16.mxu0 %v1485_v51  ;;  %v1390_v57 = vld [vmem:[#allocation2 + $0x60] sm:$0xff]  ;;  %v897_v59 = vpop.permute.xlu1 %896 }
  0x95   :  { %v1391_v56 = vld [vmem:[#allocation2 + $0x68] sm:$0xff]  ;;  %350 = vst.msk [vmem:[#allocation2 + $0x80] sm:$0xff] %vm333_vm1, %v314_v55 }
  0x96   :  { %351 = vst.msk [vmem:[#allocation2 + $0x88] sm:$0xff] %vm21_vm0, %v314_v55  ;;  %1798 = vmatprep.subr.bf16.mxu1 %v1391_v56  ;;  %738 = vrot.lane.b32.xlu0 %v2484_v53, %s2596_s23  ;;  %v1486_v3 = vld [vmem:[#allocation2 + $0x360] sm:$0xff] }
  0x97   :  { %v1487_v60 = vld [vmem:[#allocation2 + $0x368] sm:$0xff]  ;;  %1799 = vmatpush1.bf16.msra.mxu1 %v1390_v57  ;;  %934 = vst.msk [vmem:[#allocation2 + $0x380] sm:$0xff] %vm916_vm2, %v897_v59  ;;  %1986 = vmatpush1.bf16.msra.mxu0 %v1484_v58 }
  0x98   :  { %935 = vst.msk [vmem:[#allocation2 + $0x388] sm:$0xff] %vm918_vm3, %v897_v59  ;;  %740 = vrot.lane.b32.xlu1 %v2485_v54, %s2596_s23  ;;  %v316_v0 = vpop.permute.xlu0 %315  ;;  %1987 = vmatprep.subr.bf16.mxu0 %v1487_v60  ;;  %v1392_v2 = vld [vmem:[#allocation2 + $0x70] sm:$0xff]  ;;  %v899_v4 = vpop.permute.xlu1 %898  ;;  %v3341_v54 = vld [vmem:[%s3609_s0 + $0x40] sm:$0xff]  }
  0x99   :  { %v1393_v1 = vld [vmem:[#allocation2 + $0x78] sm:$0xff]  ;;  %352 = vst.msk [vmem:[#allocation2 + $0x90] sm:$0xff] %vm333_vm1, %v316_v0 }
  0x9a   :  { %353 = vst.msk [vmem:[#allocation2 + $0x98] sm:$0xff] %vm21_vm0, %v316_v0  ;;  %1800 = vmatprep.subr.bf16.mxu1 %v1393_v1  ;;  %742 = vrot.lane.b32.xlu0 %v2486_v62, %s2596_s23  ;;  %v1488_v12 = vld [vmem:[#allocation2 + $0x370] sm:$0xff] }
  0x9b   :  { %v1489_v5 = vld [vmem:[#allocation2 + $0x378] sm:$0xff]  ;;  %1801 = vmatpush1.bf16.msra.mxu1 %v1392_v2  ;;  %936 = vst.msk [vmem:[#allocation2 + $0x390] sm:$0xff] %vm916_vm2, %v899_v4  ;;  %1988 = vmatpush1.bf16.msra.mxu0 %v1486_v3  ;;  %v2493_v3 = vld [vmem:[%s3610_s1] ss:$48 sps:$4 sm:$0xff]  }
  0x9c   :  { %937 = vst.msk [vmem:[#allocation2 + $0x398] sm:$0xff] %vm918_vm3, %v899_v4  ;;  %744 = vrot.lane.b32.xlu1 %v2487_v63, %s2596_s23  ;;  %v318_v9 = vpop.permute.xlu0 %317  ;;  %1989 = vmatprep.subr.bf16.mxu0 %v1489_v5  ;;  %v1394_v11 = vld [vmem:[#allocation2 + $0x80] sm:$0xff]  ;;  %v901_v13 = vpop.permute.xlu1 %900  ;;  %v3362_v5 = vld [vmem:[%s3609_s0 + $0x50] sm:$0xff]  }
  0x9d   :  { %v1395_v10 = vld [vmem:[#allocation2 + $0x88] sm:$0xff]  ;;  %354 = vst.msk [vmem:[#allocation2 + $0xa0] sm:$0xff] %vm333_vm1, %v318_v9 }
  0x9e   :  { %355 = vst.msk [vmem:[#allocation2 + $0xa8] sm:$0xff] %vm21_vm0, %v318_v9  ;;  %1802 = vmatprep.subr.bf16.mxu1 %v1395_v10  ;;  %746 = vrot.lane.b32.xlu0 %v2488_v7, %s2596_s23  ;;  %v1490_v21 = vld [vmem:[#allocation2 + $0x380] sm:$0xff] }
  0x9f   :  { %v1491_v14 = vld [vmem:[#allocation2 + $0x388] sm:$0xff]  ;;  %1803 = vmatpush1.bf16.msra.mxu1 %v1394_v11  ;;  %938 = vst.msk [vmem:[#allocation2 + $0x3a0] sm:$0xff] %vm916_vm2, %v901_v13  ;;  %1990 = vmatpush1.bf16.msra.mxu0 %v1488_v12 }
  0xa0   :  { %939 = vst.msk [vmem:[#allocation2 + $0x3a8] sm:$0xff] %vm918_vm3, %v901_v13  ;;  %748 = vrot.lane.b32.xlu1 %v2489_v8, %s2596_s23  ;;  %v320_v18 = vpop.permute.xlu0 %319  ;;  %1991 = vmatprep.subr.bf16.mxu0 %v1491_v14  ;;  %v1396_v20 = vld [vmem:[#allocation2 + $0x90] sm:$0xff]  ;;  %v903_v22 = vpop.permute.xlu1 %902  ;;  %v2497_v13 = vld [vmem:[%s3610_s1 + $0x18] ss:$48 sps:$4 sm:$0xff]  }
  0xa1   :  { %v1397_v19 = vld [vmem:[#allocation2 + $0x98] sm:$0xff]  ;;  %356 = vst.msk [vmem:[#allocation2 + $0xb0] sm:$0xff] %vm333_vm1, %v320_v18 }
  0xa2   :  { %357 = vst.msk [vmem:[#allocation2 + $0xb8] sm:$0xff] %vm21_vm0, %v320_v18  ;;  %1804 = vmatprep.subr.bf16.mxu1 %v1397_v19  ;;  %750 = vrot.lane.b32.xlu0 %v2490_v16, %s2596_s23  ;;  %v1492_v30 = vld [vmem:[#allocation2 + $0x390] sm:$0xff]  ;;  %v3379_v14 = vld [vmem:[%s3609_s0 + $0x58] sm:$0xff]  }
  0xa3   :  { %v1493_v23 = vld [vmem:[#allocation2 + $0x398] sm:$0xff]  ;;  %1805 = vmatpush1.bf16.msra.mxu1 %v1396_v20  ;;  %940 = vst.msk [vmem:[#allocation2 + $0x3b0] sm:$0xff] %vm916_vm2, %v903_v22  ;;  %1992 = vmatpush1.bf16.msra.mxu0 %v1490_v21 }
  0xa4   :  { %941 = vst.msk [vmem:[#allocation2 + $0x3b8] sm:$0xff] %vm918_vm3, %v903_v22  ;;  %752 = vrot.lane.b32.xlu1 %v2491_v17, %s2596_s23  ;;  %v443_v27 = vpop.permute.xlu0 %442  ;;  %1993 = vmatprep.subr.bf16.mxu0 %v1493_v23  ;;  %v1398_v29 = vld [vmem:[#allocation2 + $0xa0] sm:$0xff]  ;;  %v1027_v31 = vpop.permute.xlu1 %1026 }
  0xa5   :  { %v1399_v28 = vld [vmem:[#allocation2 + $0xa8] sm:$0xff]  ;;  %479 = vst.msk [vmem:[#allocation2 + $0xc0] sm:$0xff] %vm478_vm4, %v443_v27  ;;  %v2502_v22 = vld [vmem:[%s3610_s1 + $0x60] ss:$48 sps:$4 sm:$0xff]   ;;  %v2506_v23 = vld [vmem:[%s3610_s1 + $0xc4] ss:$48 sps:$4 sm:$0xff]  }
  0xa6   :  { %481 = vst.msk [vmem:[#allocation2 + $0xc8] sm:$0xff] %vm480_vm5, %v443_v27  ;;  %1806 = vmatprep.subr.bf16.mxu1 %v1399_v28  ;;  %754 = vrot.lane.b32.xlu0 %v2492_v25, %s2596_s23  ;;  %v1494_v37 = vld [vmem:[#allocation2 + $0x3a0] sm:$0xff] }
  0xa7   :  { %v1495_v32 = vld [vmem:[#allocation2 + $0x3a8] sm:$0xff]  ;;  %1807 = vmatpush1.bf16.msra.mxu1 %v1398_v29  ;;  %1063 = vst.msk [vmem:[#allocation2 + $0x3c0] sm:$0xff] %vm1062_vm6, %v1027_v31  ;;  %1994 = vmatpush1.bf16.msra.mxu0 %v1492_v30 }
  0xa8   :  { %1065 = vst.msk [vmem:[#allocation2 + $0x3c8] sm:$0xff] %vm1064_vm7, %v1027_v31  ;;  %756 = vrot.lane.b32.xlu1 %v2496_v26, %s2596_s23  ;;  %v445_v34 = vpop.permute.xlu0 %444  ;;  %1995 = vmatprep.subr.bf16.mxu0 %v1495_v32  ;;  %v1400_v36 = vld [vmem:[#allocation2 + $0xb0] sm:$0xff]  ;;  %v1029_v38 = vpop.permute.xlu1 %1028  ;;  %v2505_v30 = vld [vmem:[%s3610_s1 + $0x78] ss:$48 sps:$4 sm:$0xff]   ;;  %v2509_v31 = vld [vmem:[%s3610_s1 + $0xdc] ss:$48 sps:$4 sm:$0xff]  }
  0xa9   :  { %v1401_v35 = vld [vmem:[#allocation2 + $0xb8] sm:$0xff]  ;;  %482 = vst.msk [vmem:[#allocation2 + $0xd0] sm:$0xff] %vm478_vm4, %v445_v34 }
  0xaa   :  { %483 = vst.msk [vmem:[#allocation2 + $0xd8] sm:$0xff] %vm480_vm5, %v445_v34  ;;  %1808 = vmatprep.subr.bf16.mxu1 %v1401_v35  ;;  %v1496_v44 = vld [vmem:[#allocation2 + $0x3b0] sm:$0xff] }
  0xab   :  { %v1497_v39 = vld [vmem:[#allocation2 + $0x3b8] sm:$0xff]  ;;  %1809 = vmatpush1.bf16.msra.mxu1 %v1400_v36  ;;  %1066 = vst.msk [vmem:[#allocation2 + $0x3d0] sm:$0xff] %vm1062_vm6, %v1029_v38  ;;  %1996 = vmatpush1.bf16.msra.mxu0 %v1494_v37 }
  0xac   :  { %1067 = vst.msk [vmem:[#allocation2 + $0x3d8] sm:$0xff] %vm1064_vm7, %v1029_v38  ;;  %v447_v41 = vpop.permute.xlu0 %446  ;;  %1997 = vmatprep.subr.bf16.mxu0 %v1497_v39  ;;  %v1402_v43 = vld [vmem:[#allocation2 + $0xc0] sm:$0xff]  ;;  %v1031_v45 = vpop.permute.xlu1 %1030 }
  0xad   :  { %v1403_v42 = vld [vmem:[#allocation2 + $0xc8] sm:$0xff]  ;;  %484 = vst.msk [vmem:[#allocation2 + $0xe0] sm:$0xff] %vm478_vm4, %v447_v41  ;;  %v2508_v39 = vld [vmem:[%s3610_s1 + $0xc0] ss:$48 sps:$4 sm:$0xff]  }
  0xae   :  { %485 = vst.msk [vmem:[#allocation2 + $0xe8] sm:$0xff] %vm480_vm5, %v447_v41  ;;  %1810 = vmatprep.subr.bf16.mxu1 %v1403_v42  ;;  %v1498_v51 = vld [vmem:[#allocation2 + $0x3c0] sm:$0xff]  ;;  %v2514_v41 = vld [vmem:[%s3610_s1 + $0xc] ss:$48 sps:$4 sm:$0xff]  }
  0xaf   :  { %v1499_v46 = vld [vmem:[#allocation2 + $0x3c8] sm:$0xff]  ;;  %1811 = vmatpush1.bf16.msra.mxu1 %v1402_v43  ;;  %1068 = vst.msk [vmem:[#allocation2 + $0x3e0] sm:$0xff] %vm1062_vm6, %v1031_v45  ;;  %1998 = vmatpush1.bf16.msra.mxu0 %v1496_v44 }
  0xb0   :  { %1069 = vst.msk [vmem:[#allocation2 + $0x3e8] sm:$0xff] %vm1064_vm7, %v1031_v45  ;;  %v449_v48 = vpop.permute.xlu0 %448  ;;  %1999 = vmatprep.subr.bf16.mxu0 %v1499_v46  ;;  %v1404_v50 = vld [vmem:[#allocation2 + $0xd0] sm:$0xff]  ;;  %v1033_v52 = vpop.permute.xlu1 %1032 }
  0xb1   :  { %v1405_v49 = vld [vmem:[#allocation2 + $0xd8] sm:$0xff]  ;;  %486 = vst.msk [vmem:[#allocation2 + $0xf0] sm:$0xff] %vm478_vm4, %v449_v48 }
  0xb2   :  { %487 = vst.msk [vmem:[#allocation2 + $0xf8] sm:$0xff] %vm480_vm5, %v449_v48  ;;  %1812 = vmatprep.subr.bf16.mxu1 %v1405_v49  ;;  %v1500_v58 = vld [vmem:[#allocation2 + $0x3d0] sm:$0xff]  ;;  %v2511_v49 = vld [vmem:[%s3610_s1 + $0xd8] ss:$48 sps:$4 sm:$0xff]  }
  0xb3   :  { %v1501_v53 = vld [vmem:[#allocation2 + $0x3d8] sm:$0xff]  ;;  %1813 = vmatpush1.bf16.msra.mxu1 %v1404_v50  ;;  %1070 = vst.msk [vmem:[#allocation2 + $0x3f0] sm:$0xff] %vm1062_vm6, %v1033_v52  ;;  %2000 = vmatpush1.bf16.msra.mxu0 %v1498_v51  ;;  %v2517_v50 = vld [vmem:[%s3610_s1 + $0x24] ss:$48 sps:$4 sm:$0xff]  }
  0xb4   :  { %1071 = vst.msk [vmem:[#allocation2 + $0x3f8] sm:$0xff] %vm1064_vm7, %v1033_v52  ;;  %v451_v55 = vpop.permute.xlu0 %450  ;;  %2001 = vmatprep.subr.bf16.mxu0 %v1501_v53  ;;  %v1406_v57 = vld [vmem:[#allocation2 + $0xe0] sm:$0xff]  ;;  %v1035_v59 = vpop.permute.xlu1 %1034 }
  0xb5   :  { %v1407_v56 = vld [vmem:[#allocation2 + $0xe8] sm:$0xff]  ;;  %488 = vst.msk [vmem:[#allocation2 + $0x100] sm:$0xff] %vm478_vm4, %v451_v55 }
  0xb6   :  { %489 = vst.msk [vmem:[#allocation2 + $0x108] sm:$0xff] %vm480_vm5, %v451_v55  ;;  %1814 = vmatprep.subr.bf16.mxu1 %v1407_v56  ;;  %v1502_v1 = vld [vmem:[#allocation2 + $0x3e0] sm:$0xff] }
  0xb7   :  { %v1503_v60 = vld [vmem:[#allocation2 + $0x3e8] sm:$0xff]  ;;  %1815 = vmatpush1.bf16.msra.mxu1 %v1406_v57  ;;  %1072 = vst.msk [vmem:[#allocation2 + $0x400] sm:$0xff] %vm1062_vm6, %v1035_v59  ;;  %2002 = vmatpush1.bf16.msra.mxu0 %v1500_v58  ;;  %v1570_v58 = vld [vmem:[%s3611_s2] sm:$0xff] }
  0xb8   :  { %1073 = vst.msk [vmem:[#allocation2 + $0x408] sm:$0xff] %vm1064_vm7, %v1035_v59  ;;  %v453_v62 = vpop.permute.xlu0 %452  ;;  %2003 = vmatprep.subr.bf16.mxu0 %v1503_v60  ;;  %v1408_v0 = vld [vmem:[#allocation2 + $0xf0] sm:$0xff]  ;;  %v1037_v2 = vpop.permute.xlu1 %1036  ;;  %v1571_v59 = vld [vmem:[%s3611_s2 + $0x8] sm:$0xff]  ;;  %1578 = vperm.xlu0 %2408, %v1570_v58  }
  0xb9   :  { %v1409_v63 = vld [vmem:[#allocation2 + $0xf8] sm:$0xff]  ;;  %490 = vst.msk [vmem:[#allocation2 + $0x110] sm:$0xff] %vm478_vm4, %v453_v62  ;;  %1583 = vperm.xlu1 %2409, %v1571_v59  }
  0xba   :  { %491 = vst.msk [vmem:[#allocation2 + $0x118] sm:$0xff] %vm480_vm5, %v453_v62  ;;  %1816 = vmatprep.subr.bf16.mxu1 %v1409_v63  ;;  %v1504_v10 = vld [vmem:[#allocation2 + $0x3f0] sm:$0xff] }
  0xbb   :  { %v1505_v4 = vld [vmem:[#allocation2 + $0x3f8] sm:$0xff]  ;;  %1817 = vmatpush1.bf16.msra.mxu1 %v1408_v0  ;;  %1074 = vst.msk [vmem:[#allocation2 + $0x410] sm:$0xff] %vm1062_vm6, %v1037_v2  ;;  %2004 = vmatpush1.bf16.msra.mxu0 %v1502_v1 }
  0xbc   :  { %1075 = vst.msk [vmem:[#allocation2 + $0x418] sm:$0xff] %vm1064_vm7, %v1037_v2  ;;  %v455_v7 = vpop.permute.xlu0 %454  ;;  %2005 = vmatprep.subr.bf16.mxu0 %v1505_v4  ;;  %v1410_v9 = vld [vmem:[#allocation2 + $0x100] sm:$0xff]  ;;  %v1039_v11 = vpop.permute.xlu1 %1038  ;;  %v1572_v4 = vld [vmem:[%s3611_s2 + $0x10] sm:$0xff] }
  0xbd   :  { %v1411_v8 = vld [vmem:[#allocation2 + $0x108] sm:$0xff]  ;;  %492 = vst.msk [vmem:[#allocation2 + $0x120] sm:$0xff] %vm478_vm4, %v455_v7  ;;  %1588 = vperm.xlu1 %2409, %v1572_v4  }
  0xbe   :  { %493 = vst.msk [vmem:[#allocation2 + $0x128] sm:$0xff] %vm480_vm5, %v455_v7  ;;  %1849 = vmatprep.subr.bf16.mxu1 %v1411_v8  ;;  %1819 = vmatmul.mubr.bf16.vlgmr.msra.gmra.mrb[0].mxu1 %v2493_v3  ;;  %v1506_v19 = vld [vmem:[#allocation2 + $0x400] sm:$0xff]  ;;  %v1573_v3 = vld [vmem:[%s3611_s2 + $0x18] sm:$0xff] }
  0xbf   :  { %v1507_v12 = vld [vmem:[#allocation2 + $0x408] sm:$0xff]  ;;  %1850 = vmatpush1.bf16.msra.mxu1 %v1410_v9  ;;  %1076 = vst.msk [vmem:[#allocation2 + $0x420] sm:$0xff] %vm1062_vm6, %v1039_v11  ;;  %1828 = vmatprep.mubr.bf16.mxu1 %v2500_v6 }
  0xc0   :  { %1077 = vst.msk [vmem:[#allocation2 + $0x428] sm:$0xff] %vm1064_vm7, %v1039_v11  ;;  %2006 = vmatpush1.bf16.msra.mxu0 %v1504_v10  ;;  %v457_v16 = vpop.permute.xlu0 %456  ;;  %v1412_v18 = vld [vmem:[#allocation2 + $0x110] sm:$0xff]  ;;  %v1041_v20 = vpop.permute.xlu1 %1040  ;;  %1593 = vperm.xlu0 %2408, %v1573_v3   ;;  %v2512_v3 = vld [vmem:[%s3610_s1 + $0x8] ss:$48 sps:$4 sm:$0xff]  }
  0xc1   :  { %v1413_v17 = vld [vmem:[#allocation2 + $0x118] sm:$0xff]  ;;  %2038 = vmatprep.subr.bf16.mxu0 %v1507_v12  ;;  %494 = vst.msk [vmem:[#allocation2 + $0x130] sm:$0xff] %vm478_vm4, %v457_v16  ;;  %v1575_v12 = vld [vmem:[%s3611_s2 + $0x28] sm:$0xff] }
  0xc2   :  { %495 = vst.msk [vmem:[#allocation2 + $0x138] sm:$0xff] %vm480_vm5, %v457_v16  ;;  %1851 = vmatprep.subr.bf16.mxu1 %v1413_v17  ;;  %v1508_v27 = vld [vmem:[#allocation2 + $0x410] sm:$0xff] }
  0xc3   :  { %v1509_v21 = vld [vmem:[#allocation2 + $0x418] sm:$0xff]  ;;  %1852 = vmatpush1.bf16.msra.mxu1 %v1412_v18  ;;  %2008 = vmatmul.mubr.bf16.vlgmr.msra.gmra.mrb[0].mxu0 %v2497_v13  ;;  %1078 = vst.msk [vmem:[#allocation2 + $0x430] sm:$0xff] %vm1062_vm6, %v1041_v20  ;;  %v1574_v13 = vld [vmem:[%s3611_s2 + $0x20] sm:$0xff] }
  0xc4   :  { %1079 = vst.msk [vmem:[#allocation2 + $0x438] sm:$0xff] %vm1064_vm7, %v1041_v20  ;;  %2039 = vmatpush1.bf16.msra.mxu0 %v1506_v19  ;;  %2017 = vmatprep.mubr.bf16.mxu0 %v2503_v15  ;;  %v459_v24 = vpop.permute.xlu0 %458  ;;  %v1414_v26 = vld [vmem:[#allocation2 + $0x120] sm:$0xff]  ;;  %v1043_v28 = vpop.permute.xlu1 %1042 }
  0xc5   :  { %v1415_v25 = vld [vmem:[#allocation2 + $0x128] sm:$0xff]  ;;  %2040 = vmatprep.subr.bf16.mxu0 %v1509_v21  ;;  %496 = vst.msk [vmem:[#allocation2 + $0x140] sm:$0xff] %vm478_vm4, %v459_v24  ;;  %1603 = vperm.xlu0 %2408, %v1575_v12  }
  0xc6   :  { %497 = vst.msk [vmem:[#allocation2 + $0x148] sm:$0xff] %vm480_vm5, %v459_v24  ;;  %1853 = vmatprep.subr.bf16.mxu1 %v1415_v25  ;;  %1829 = vmatmul.mubr.bf16.gmra.mrb[4].mxu1 %v2502_v22  ;;  %v1510_v36 = vld [vmem:[#allocation2 + $0x420] sm:$0xff] }
  0xc7   :  { %v1511_v29 = vld [vmem:[#allocation2 + $0x428] sm:$0xff]  ;;  %1854 = vmatpush1.bf16.msra.mxu1 %v1414_v26  ;;  %1080 = vst.msk [vmem:[#allocation2 + $0x440] sm:$0xff] %vm1062_vm6, %v1043_v28  ;;  %1838 = vmatprep.mubr.bf16.mxu1 %v2506_v23 }
  0xc8   :  { %1081 = vst.msk [vmem:[#allocation2 + $0x448] sm:$0xff] %vm1064_vm7, %v1043_v28  ;;  %2041 = vmatpush1.bf16.msra.mxu0 %v1508_v27  ;;  %v461_v32 = vpop.permute.xlu0 %460  ;;  %v1416_v35 = vld [vmem:[#allocation2 + $0x130] sm:$0xff]  ;;  %v1045_v37 = vpop.permute.xlu1 %1044  ;;  %1598 = vperm.xlu1 %2409, %v1574_v13  }
  0xc9   :  { %v1417_v34 = vld [vmem:[#allocation2 + $0x138] sm:$0xff]  ;;  %2042 = vmatprep.subr.bf16.mxu0 %v1511_v29  ;;  %498 = vst.msk [vmem:[#allocation2 + $0x150] sm:$0xff] %vm478_vm4, %v461_v32  ;;  %v2515_v13 = vld [vmem:[%s3610_s1 + $0x20] ss:$48 sps:$4 sm:$0xff]  }
  0xca   :  { %499 = vst.msk [vmem:[#allocation2 + $0x158] sm:$0xff] %vm480_vm5, %v461_v32  ;;  %1855 = vmatprep.subr.bf16.mxu1 %v1417_v34  ;;  %v1512_v45 = vld [vmem:[#allocation2 + $0x430] sm:$0xff] }
  0xcb   :  { %v1513_v38 = vld [vmem:[#allocation2 + $0x438] sm:$0xff]  ;;  %1856 = vmatpush1.bf16.msra.mxu1 %v1416_v35  ;;  %1082 = vst.msk [vmem:[#allocation2 + $0x450] sm:$0xff] %vm1062_vm6, %v1045_v37  ;;  %2018 = vmatmul.mubr.bf16.gmra.mrb[4].mxu0 %v2505_v30 }
  0xcc   :  { %1083 = vst.msk [vmem:[#allocation2 + $0x458] sm:$0xff] %vm1064_vm7, %v1045_v37  ;;  %2043 = vmatpush1.bf16.msra.mxu0 %v1510_v36  ;;  %2027 = vmatprep.mubr.bf16.mxu0 %v2509_v31  ;;  %v463_v42 = vpop.permute.xlu0 %462  ;;  %v1418_v44 = vld [vmem:[#allocation2 + $0x140] sm:$0xff]  ;;  %v1047_v46 = vpop.permute.xlu1 %1046 }
  0xcd   :  { %v1419_v43 = vld [vmem:[#allocation2 + $0x148] sm:$0xff]  ;;  %2044 = vmatprep.subr.bf16.mxu0 %v1513_v38  ;;  %500 = vst.msk [vmem:[#allocation2 + $0x160] sm:$0xff] %vm478_vm4, %v463_v42 }
  0xce   :  { %501 = vst.msk [vmem:[#allocation2 + $0x168] sm:$0xff] %vm480_vm5, %v463_v42  ;;  %1857 = vmatprep.subr.bf16.mxu1 %v1419_v43  ;;  %1839 = vmatmul.mubr.bf16.gmra.mrb[8].mxu1 %v2508_v39  ;;  %v1514_v55 = vld [vmem:[#allocation2 + $0x440] sm:$0xff] }
  0xcf   :  { %v1515_v48 = vld [vmem:[#allocation2 + $0x448] sm:$0xff]  ;;  %1858 = vmatpush1.bf16.msra.mxu1 %v1418_v44  ;;  %1084 = vst.msk [vmem:[#allocation2 + $0x460] sm:$0xff] %vm1062_vm6, %v1047_v46  ;;  %1881 = vmatprep.mubr.bf16.mxu1 %v2514_v41 }
  0xd0   :  { %1085 = vst.msk [vmem:[#allocation2 + $0x468] sm:$0xff] %vm1064_vm7, %v1047_v46  ;;  %2045 = vmatpush1.bf16.msra.mxu0 %v1512_v45  ;;  %v465_v51 = vpop.permute.xlu0 %464  ;;  %v1420_v53 = vld [vmem:[#allocation2 + $0x150] sm:$0xff]  ;;  %v1049_v56 = vpop.permute.xlu1 %1048 }
  0xd1   :  { %v1421_v52 = vld [vmem:[#allocation2 + $0x158] sm:$0xff]  ;;  %2046 = vmatprep.subr.bf16.mxu0 %v1515_v48  ;;  %502 = vst.msk [vmem:[#allocation2 + $0x170] sm:$0xff] %vm478_vm4, %v465_v51 }
  0xd2   :  { %503 = vst.msk [vmem:[#allocation2 + $0x178] sm:$0xff] %vm480_vm5, %v465_v51  ;;  %1859 = vmatprep.subr.bf16.mxu1 %v1421_v52  ;;  %v1516_v0 = vld [vmem:[#allocation2 + $0x450] sm:$0xff] }
  0xd3   :  { %v1517_v57 = vld [vmem:[#allocation2 + $0x458] sm:$0xff]  ;;  %1860 = vmatpush1.bf16.msra.mxu1 %v1420_v53  ;;  %1086 = vst.msk [vmem:[#allocation2 + $0x470] sm:$0xff] %vm1062_vm6, %v1049_v56  ;;  %2028 = vmatmul.mubr.bf16.gmra.mrb[8].mxu0 %v2511_v49 }
  0xd4   :  { %1087 = vst.msk [vmem:[#allocation2 + $0x478] sm:$0xff] %vm1064_vm7, %v1049_v56  ;;  %2047 = vmatpush1.bf16.msra.mxu0 %v1514_v55  ;;  %2070 = vmatprep.mubr.bf16.mxu0 %v2517_v50  ;;  %v589_v60 = vpop.permute.xlu0 %588  ;;  %v1422_v63 = vld [vmem:[#allocation2 + $0x160] sm:$0xff]  ;;  %v1173_v1 = vpop.permute.xlu1 %1172 }
  0xd5   :  { %v1423_v62 = vld [vmem:[#allocation2 + $0x168] sm:$0xff]  ;;  %2048 = vmatprep.subr.bf16.mxu0 %v1517_v57  ;;  %625 = vst.msk [vmem:[#allocation2 + $0x180] sm:$0xff] %vm624_vm8, %v589_v60 }
  0xd6   :  { %627 = vst.msk [vmem:[#allocation2 + $0x188] sm:$0xff] %vm626_vm9, %v589_v60  ;;  %1861 = vmatprep.subr.bf16.mxu1 %v1423_v62  ;;  %v1518_v9 = vld [vmem:[#allocation2 + $0x460] sm:$0xff] }
  0xd7   :  { %v1519_v2 = vld [vmem:[#allocation2 + $0x468] sm:$0xff]  ;;  %1862 = vmatpush1.bf16.msra.mxu1 %v1422_v63  ;;  %1209 = vst.msk [vmem:[#allocation2 + $0x480] sm:$0xff] %vm1208_vm10, %v1173_v1 }
  0xd8   :  { %1211 = vst.msk [vmem:[#allocation2 + $0x488] sm:$0xff] %vm1210_vm11, %v1173_v1  ;;  %2049 = vmatpush1.bf16.msra.mxu0 %v1516_v0  ;;  %v591_v6 = vpop.permute.xlu0 %590  ;;  %v1424_v8 = vld [vmem:[#allocation2 + $0x170] sm:$0xff]  ;;  %v1175_v10 = vpop.permute.xlu1 %1174 }
  0xd9   :  { %v1425_v7 = vld [vmem:[#allocation2 + $0x178] sm:$0xff]  ;;  %2050 = vmatprep.subr.bf16.mxu0 %v1519_v2  ;;  %628 = vst.msk [vmem:[#allocation2 + $0x190] sm:$0xff] %vm624_vm8, %v591_v6 }
  0xda   :  { %629 = vst.msk [vmem:[#allocation2 + $0x198] sm:$0xff] %vm626_vm9, %v591_v6  ;;  %1863 = vmatprep.subr.bf16.mxu1 %v1425_v7  ;;  %v1520_v18 = vld [vmem:[#allocation2 + $0x470] sm:$0xff]  ;;  %v2525_v6 = vld [vmem:[%s3610_s1 + $0x6c] ss:$48 sps:$4 sm:$0xff]  }
  0xdb   :  { %v1521_v11 = vld [vmem:[#allocation2 + $0x478] sm:$0xff]  ;;  %1864 = vmatpush1.bf16.msra.mxu1 %v1424_v8  ;;  %1212 = vst.msk [vmem:[#allocation2 + $0x490] sm:$0xff] %vm1208_vm10, %v1175_v10 }
  0xdc   :  { %1213 = vst.msk [vmem:[#allocation2 + $0x498] sm:$0xff] %vm1210_vm11, %v1175_v10  ;;  %2051 = vmatpush1.bf16.msra.mxu0 %v1518_v9  ;;  %v593_v15 = vpop.permute.xlu0 %592  ;;  %v1426_v17 = vld [vmem:[#allocation2 + $0x180] sm:$0xff]  ;;  %v1177_v19 = vpop.permute.xlu1 %1176 }
  0xdd   :  { %v1427_v16 = vld [vmem:[#allocation2 + $0x188] sm:$0xff]  ;;  %2052 = vmatprep.subr.bf16.mxu0 %v1521_v11  ;;  %630 = vst.msk [vmem:[#allocation2 + $0x1a0] sm:$0xff] %vm624_vm8, %v593_v15 }
  0xde   :  { %631 = vst.msk [vmem:[#allocation2 + $0x1a8] sm:$0xff] %vm626_vm9, %v593_v15  ;;  %1865 = vmatprep.subr.bf16.mxu1 %v1427_v16  ;;  %v1522_v24 = vld [vmem:[#allocation2 + $0x480] sm:$0xff] }
  0xdf   :  { %v1523_v20 = vld [vmem:[#allocation2 + $0x488] sm:$0xff]  ;;  %1866 = vmatpush1.bf16.msra.mxu1 %v1426_v17  ;;  %1214 = vst.msk [vmem:[#allocation2 + $0x4a0] sm:$0xff] %vm1208_vm10, %v1177_v19  ;;  %v2529_v15 = vld [vmem:[%s3610_s1 + $0x84] ss:$48 sps:$4 sm:$0xff]  }
  0xe0   :  { %1215 = vst.msk [vmem:[#allocation2 + $0x4a8] sm:$0xff] %vm1210_vm11, %v1177_v19  ;;  %2053 = vmatpush1.bf16.msra.mxu0 %v1520_v18  ;;  %v595_v21 = vpop.permute.xlu0 %594  ;;  %v1428_v23 = vld [vmem:[#allocation2 + $0x190] sm:$0xff]  ;;  %v1179_v25 = vpop.permute.xlu1 %1178 }
  0xe1   :  { %v1429_v22 = vld [vmem:[#allocation2 + $0x198] sm:$0xff]  ;;  %2054 = vmatprep.subr.bf16.mxu0 %v1523_v20  ;;  %632 = vst.msk [vmem:[#allocation2 + $0x1b0] sm:$0xff] %vm624_vm8, %v595_v21 }
  0xe2   :  { %633 = vst.msk [vmem:[#allocation2 + $0x1b8] sm:$0xff] %vm626_vm9, %v595_v21  ;;  %1867 = vmatprep.subr.bf16.mxu1 %v1429_v22  ;;  %v1524_v30 = vld [vmem:[#allocation2 + $0x490] sm:$0xff]  ;;  %v2527_v22 = vld [vmem:[%s3610_s1 + $0x68] ss:$48 sps:$4 sm:$0xff]  }
  0xe3   :  { %v1525_v26 = vld [vmem:[#allocation2 + $0x498] sm:$0xff]  ;;  %1868 = vmatpush1.bf16.msra.mxu1 %v1428_v23  ;;  %1216 = vst.msk [vmem:[#allocation2 + $0x4b0] sm:$0xff] %vm1208_vm10, %v1179_v25 }
  0xe4   :  { %1217 = vst.msk [vmem:[#allocation2 + $0x4b8] sm:$0xff] %vm1210_vm11, %v1179_v25  ;;  %2055 = vmatpush1.bf16.msra.mxu0 %v1522_v24  ;;  %v597_v27 = vpop.permute.xlu0 %596  ;;  %v1430_v29 = vld [vmem:[#allocation2 + $0x1a0] sm:$0xff]  ;;  %v1181_v31 = vpop.permute.xlu1 %1180  ;;  %v2533_v23 = vld [vmem:[%s3610_s1 + $0xcc] ss:$48 sps:$4 sm:$0xff]  }
  0xe5   :  { %v1431_v28 = vld [vmem:[#allocation2 + $0x1a8] sm:$0xff]  ;;  %2056 = vmatprep.subr.bf16.mxu0 %v1525_v26  ;;  %634 = vst.msk [vmem:[#allocation2 + $0x1c0] sm:$0xff] %vm624_vm8, %v597_v27 }
  0xe6   :  { %635 = vst.msk [vmem:[#allocation2 + $0x1c8] sm:$0xff] %vm626_vm9, %v597_v27  ;;  %1869 = vmatprep.subr.bf16.mxu1 %v1431_v28  ;;  %v1526_v37 = vld [vmem:[#allocation2 + $0x4a0] sm:$0xff] }
  0xe7   :  { %v1527_v32 = vld [vmem:[#allocation2 + $0x4a8] sm:$0xff]  ;;  %1870 = vmatpush1.bf16.msra.mxu1 %v1430_v29  ;;  %1218 = vst.msk [vmem:[#allocation2 + $0x4c0] sm:$0xff] %vm1208_vm10, %v1181_v31 }
  0xe8   :  { %1219 = vst.msk [vmem:[#allocation2 + $0x4c8] sm:$0xff] %vm1210_vm11, %v1181_v31  ;;  %2057 = vmatpush1.bf16.msra.mxu0 %v1524_v30  ;;  %v599_v34 = vpop.permute.xlu0 %598  ;;  %v1432_v36 = vld [vmem:[#allocation2 + $0x1b0] sm:$0xff]  ;;  %v1183_v38 = vpop.permute.xlu1 %1182 }
  0xe9   :  { %v1433_v35 = vld [vmem:[#allocation2 + $0x1b8] sm:$0xff]  ;;  %2058 = vmatprep.subr.bf16.mxu0 %v1527_v32  ;;  %636 = vst.msk [vmem:[#allocation2 + $0x1d0] sm:$0xff] %vm624_vm8, %v599_v34  ;;  %v2531_v30 = vld [vmem:[%s3610_s1 + $0x80] ss:$48 sps:$4 sm:$0xff]   ;;  %v2537_v31 = vld [vmem:[%s3610_s1 + $0xe4] ss:$48 sps:$4 sm:$0xff]  }
  0xea   :  { %637 = vst.msk [vmem:[#allocation2 + $0x1d8] sm:$0xff] %vm626_vm9, %v599_v34  ;;  %1871 = vmatprep.subr.bf16.mxu1 %v1433_v35  ;;  %v1528_v44 = vld [vmem:[#allocation2 + $0x4b0] sm:$0xff] }
  0xeb   :  { %v1529_v39 = vld [vmem:[#allocation2 + $0x4b8] sm:$0xff]  ;;  %1872 = vmatpush1.bf16.msra.mxu1 %v1432_v36  ;;  %1220 = vst.msk [vmem:[#allocation2 + $0x4d0] sm:$0xff] %vm1208_vm10, %v1183_v38 }
  0xec   :  { %1221 = vst.msk [vmem:[#allocation2 + $0x4d8] sm:$0xff] %vm1210_vm11, %v1183_v38  ;;  %2059 = vmatpush1.bf16.msra.mxu0 %v1526_v37  ;;  %v601_v41 = vpop.permute.xlu0 %600  ;;  %v1434_v43 = vld [vmem:[#allocation2 + $0x1c0] sm:$0xff]  ;;  %v1185_v45 = vpop.permute.xlu1 %1184 }
  0xed   :  { %v1435_v42 = vld [vmem:[#allocation2 + $0x1c8] sm:$0xff]  ;;  %2060 = vmatprep.subr.bf16.mxu0 %v1529_v39  ;;  %638 = vst.msk [vmem:[#allocation2 + $0x1e0] sm:$0xff] %vm624_vm8, %v601_v41 }
  0xee   :  { %639 = vst.msk [vmem:[#allocation2 + $0x1e8] sm:$0xff] %vm626_vm9, %v601_v41  ;;  %1873 = vmatprep.subr.bf16.mxu1 %v1435_v42  ;;  %v1530_v51 = vld [vmem:[#allocation2 + $0x4c0] sm:$0xff]  ;;  %v2535_v39 = vld [vmem:[%s3610_s1 + $0xc8] ss:$48 sps:$4 sm:$0xff]  }
  0xef   :  { %v1531_v46 = vld [vmem:[#allocation2 + $0x4c8] sm:$0xff]  ;;  %1874 = vmatpush1.bf16.msra.mxu1 %v1434_v43  ;;  %1222 = vst.msk [vmem:[#allocation2 + $0x4e0] sm:$0xff] %vm1208_vm10, %v1185_v45  ;;  %v2543_v41 = vld [vmem:[%s3610_s1 + $0x14] ss:$48 sps:$4 sm:$0xff]  }
  0xf0   :  { %1223 = vst.msk [vmem:[#allocation2 + $0x4e8] sm:$0xff] %vm1210_vm11, %v1185_v45  ;;  %2061 = vmatpush1.bf16.msra.mxu0 %v1528_v44  ;;  %v603_v48 = vpop.permute.xlu0 %602  ;;  %v1436_v50 = vld [vmem:[#allocation2 + $0x1d0] sm:$0xff] }
  0xf1   :  { %v1437_v49 = vld [vmem:[#allocation2 + $0x1d8] sm:$0xff]  ;;  %2062 = vmatprep.subr.bf16.mxu0 %v1531_v46  ;;  %640 = vst.msk [vmem:[#allocation2 + $0x1f0] sm:$0xff] %vm624_vm8, %v603_v48  ;;  %v1187_v52 = vpop.permute.xlu1 %1186 }
  0xf2   :  { %641 = vst.msk [vmem:[#allocation2 + $0x1f8] sm:$0xff] %vm626_vm9, %v603_v48  ;;  %1875 = vmatprep.subr.bf16.mxu1 %v1437_v49  ;;  %v1532_v58 = vld [vmem:[#allocation2 + $0x4d0] sm:$0xff]  ;;  %v1547_v48 = vld [vmem:[#allocation2 + $0x548] sm:$0xff] }
  0xf3   :  { %v1533_v53 = vld [vmem:[#allocation2 + $0x4d8] sm:$0xff]  ;;  %1876 = vmatpush1.bf16.msra.mxu1 %v1436_v50  ;;  %1224 = vst.msk [vmem:[#allocation2 + $0x4f0] sm:$0xff] %vm1208_vm10, %v1187_v52  ;;  %v2539_v50 = vld [vmem:[%s3610_s1 + $0xe0] ss:$48 sps:$4 sm:$0xff]  }
  0xf4   :  { %1225 = vst.msk [vmem:[#allocation2 + $0x4f8] sm:$0xff] %vm1210_vm11, %v1187_v52  ;;  %2063 = vmatpush1.bf16.msra.mxu0 %v1530_v51  ;;  %v605_v55 = vpop.permute.xlu0 %604  ;;  %v1438_v57 = vld [vmem:[#allocation2 + $0x1e0] sm:$0xff] }
  0xf5   :  { %v1439_v56 = vld [vmem:[#allocation2 + $0x1e8] sm:$0xff]  ;;  %2064 = vmatprep.subr.bf16.mxu0 %v1533_v53  ;;  %642 = vst.msk [vmem:[#allocation2 + $0x200] sm:$0xff] %vm624_vm8, %v605_v55 }
  0xf6   :  { %643 = vst.msk [vmem:[#allocation2 + $0x208] sm:$0xff] %vm626_vm9, %v605_v55  ;;  %1877 = vmatprep.subr.bf16.mxu1 %v1439_v56  ;;  %v1189_v59 = vpop.permute.xlu1 %1188  ;;  %v1534_v1 = vld [vmem:[#allocation2 + $0x4e0] sm:$0xff]  ;;  %v2547_v55 = vld [vmem:[%s3610_s1 + $0x2c] ss:$48 sps:$4 sm:$0xff]  }
  0xf7   :  { %v1535_v60 = vld [vmem:[#allocation2 + $0x4e8] sm:$0xff]  ;;  %1878 = vmatpush1.bf16.msra.mxu1 %v1438_v57  ;;  %1226 = vst.msk [vmem:[#allocation2 + $0x500] sm:$0xff] %vm1208_vm10, %v1189_v59  ;;  %v1549_v56 = vld [vmem:[#allocation2 + $0x558] sm:$0xff] }
  0xf8   :  { %1227 = vst.msk [vmem:[#allocation2 + $0x508] sm:$0xff] %vm1210_vm11, %v1189_v59  ;;  %2065 = vmatpush1.bf16.msra.mxu0 %v1532_v58  ;;  %v607_v62 = vpop.permute.xlu0 %606  ;;  %v1440_v0 = vld [vmem:[#allocation2 + $0x1f0] sm:$0xff]  ;;  %v2560_v58 = vld [vmem:[#allocation2 + $0x540] sm:$0xff] }
  0xf9   :  { %v1441_v63 = vld [vmem:[#allocation2 + $0x1f8] sm:$0xff]  ;;  %2066 = vmatprep.subr.bf16.mxu0 %v1535_v60  ;;  %644 = vst.msk [vmem:[#allocation2 + $0x210] sm:$0xff] %vm624_vm8, %v607_v62 }
  0xfa   :  { %645 = vst.msk [vmem:[#allocation2 + $0x218] sm:$0xff] %vm626_vm9, %v607_v62  ;;  %1879 = vmatprep.subr.bf16.mxu1 %v1441_v63  ;;  %v1191_v2 = vpop.permute.xlu1 %1190  ;;  %v1536_v10 = vld [vmem:[#allocation2 + $0x4f0] sm:$0xff]  ;;  %v1551_v63 = vld [vmem:[#allocation2 + $0x568] sm:$0xff] }
  0xfb   :  { %v1537_v4 = vld [vmem:[#allocation2 + $0x4f8] sm:$0xff]  ;;  %1880 = vmatpush1.bf16.msra.mxu1 %v1440_v0  ;;  %1228 = vst.msk [vmem:[#allocation2 + $0x510] sm:$0xff] %vm1208_vm10, %v1191_v2 }
  0xfc   :  { %1229 = vst.msk [vmem:[#allocation2 + $0x518] sm:$0xff] %vm1210_vm11, %v1191_v2  ;;  %2067 = vmatpush1.bf16.msra.mxu0 %v1534_v1  ;;  %v609_v7 = vpop.permute.xlu0 %608  ;;  %v1442_v9 = vld [vmem:[#allocation2 + $0x200] sm:$0xff]  ;;  %v2561_v1 = vld [vmem:[#allocation2 + $0x550] sm:$0xff] }
  0xfd   :  { %v1443_v8 = vld [vmem:[#allocation2 + $0x208] sm:$0xff]  ;;  %2068 = vmatprep.subr.bf16.mxu0 %v1537_v4  ;;  %646 = vst.msk [vmem:[#allocation2 + $0x220] sm:$0xff] %vm624_vm8, %v609_v7 }
  0xfe   :  { %647 = vst.msk [vmem:[#allocation2 + $0x228] sm:$0xff] %vm626_vm9, %v609_v7  ;;  %1912 = vmatprep.subr.bf16.mxu1 %v1443_v8  ;;  %1882 = vmatmul.mubr.bf16.vlgmr.msra.gmra.mrb[0].mxu1 %v2512_v3  ;;  %v1193_v11 = vpop.permute.xlu1 %1192  ;;  %v1538_v19 = vld [vmem:[#allocation2 + $0x500] sm:$0xff] }
  0xff   :  { %v1539_v12 = vld [vmem:[#allocation2 + $0x508] sm:$0xff]  ;;  %1913 = vmatpush1.bf16.msra.mxu1 %v1442_v9  ;;  %1230 = vst.msk [vmem:[#allocation2 + $0x520] sm:$0xff] %vm1208_vm10, %v1193_v11  ;;  %1891 = vmatprep.mubr.bf16.mxu1 %v2525_v6  ;;  %v1553_v6 = vld [vmem:[#allocation2 + $0x578] sm:$0xff]  ;;  %v2562_v8 = vld [vmem:[#allocation2 + $0x560] sm:$0xff] }
 0x100   :  { %1231 = vst.msk [vmem:[#allocation2 + $0x528] sm:$0xff] %vm1210_vm11, %v1193_v11  ;;  %2069 = vmatpush1.bf16.msra.mxu0 %v1536_v10  ;;  %v611_v16 = vpop.permute.xlu0 %610  ;;  %v1444_v18 = vld [vmem:[#allocation2 + $0x210] sm:$0xff]  ;;  %v1555_v11 = vld [vmem:[#allocation2 + $0x588] sm:$0xff] }
 0x101   :  { %v1445_v17 = vld [vmem:[#allocation2 + $0x218] sm:$0xff]  ;;  %2101 = vmatprep.subr.bf16.mxu0 %v1539_v12  ;;  %648 = vst.msk [vmem:[#allocation2 + $0x230] sm:$0xff] %vm624_vm8, %v611_v16  ;;  %v2563_v12 = vld [vmem:[#allocation2 + $0x570] sm:$0xff] }
 0x102   :  { %649 = vst.msk [vmem:[#allocation2 + $0x238] sm:$0xff] %vm626_vm9, %v611_v16  ;;  %1914 = vmatprep.subr.bf16.mxu1 %v1445_v17  ;;  %v1195_v20 = vpop.permute.xlu1 %1194  ;;  %v1540_v27 = vld [vmem:[#allocation2 + $0x510] sm:$0xff]  ;;  %v1557_v16 = vld [vmem:[#allocation2 + $0x598] sm:$0xff]  ;;  %v2564_v17 = vld [vmem:[#allocation2 + $0x580] sm:$0xff] }
 0x103   :  { %v1541_v21 = vld [vmem:[#allocation2 + $0x518] sm:$0xff]  ;;  %1915 = vmatpush1.bf16.msra.mxu1 %v1444_v18  ;;  %2071 = vmatmul.mubr.bf16.vlgmr.msra.gmra.mrb[0].mxu0 %v2515_v13  ;;  %1232 = vst.msk [vmem:[#allocation2 + $0x530] sm:$0xff] %vm1208_vm10, %v1195_v20 }
 0x104   :  { %1233 = vst.msk [vmem:[#allocation2 + $0x538] sm:$0xff] %vm1210_vm11, %v1195_v20  ;;  %2102 = vmatpush1.bf16.msra.mxu0 %v1538_v19  ;;  %2080 = vmatprep.mubr.bf16.mxu0 %v2529_v15  ;;  %v735_v24 = vpop.permute.xlu0 %734  ;;  %v1446_v26 = vld [vmem:[#allocation2 + $0x220] sm:$0xff]  ;;  %v1559_v20 = vld [vmem:[#allocation2 + $0x5a8] sm:$0xff] }
 0x105   :  { %v1447_v25 = vld [vmem:[#allocation2 + $0x228] sm:$0xff]  ;;  %2103 = vmatprep.subr.bf16.mxu0 %v1541_v21  ;;  %771 = vst.msk [vmem:[#allocation2 + $0x240] sm:$0xff] %vm770_vm12, %v735_v24 }
 0x106   :  { %773 = vst.msk [vmem:[#allocation2 + $0x248] sm:$0xff] %vm772_vm13, %v735_v24  ;;  %1916 = vmatprep.subr.bf16.mxu1 %v1447_v25  ;;  %v737_v28 = vpop.permute.xlu1 %736  ;;  %1892 = vmatmul.mubr.bf16.gmra.mrb[4].mxu1 %v2527_v22  ;;  %v1542_v35 = vld [vmem:[#allocation2 + $0x520] sm:$0xff] }
 0x107   :  { %v1543_v29 = vld [vmem:[#allocation2 + $0x528] sm:$0xff]  ;;  %1917 = vmatpush1.bf16.msra.mxu1 %v1446_v26  ;;  %774 = vst.msk [vmem:[#allocation2 + $0x250] sm:$0xff] %vm770_vm12, %v737_v28  ;;  %1901 = vmatprep.mubr.bf16.mxu1 %v2533_v23  ;;  %v1561_v23 = vld [vmem:[#allocation2 + $0x5b8] sm:$0xff] }
 0x108   :  { %775 = vst.msk [vmem:[#allocation2 + $0x258] sm:$0xff] %vm772_vm13, %v737_v28  ;;  %2104 = vmatpush1.bf16.msra.mxu0 %v1540_v27  ;;  %v1448_v34 = vld [vmem:[#allocation2 + $0x230] sm:$0xff]  ;;  %v739_v36 = vpop.permute.xlu0 %738  ;;  %v1563_v26 = vld [vmem:[#allocation2 + $0x5c8] sm:$0xff]  ;;  %v1565_v28 = vld [vmem:[#allocation2 + $0x5d8] sm:$0xff] }
 0x109   :  { %v1449_v32 = vld [vmem:[#allocation2 + $0x238] sm:$0xff]  ;;  %2105 = vmatprep.subr.bf16.mxu0 %v1543_v29  ;;  %776 = vst.msk [vmem:[#allocation2 + $0x260] sm:$0xff] %vm770_vm12, %v739_v36 }
 0x10a   :  { %1918 = vmatprep.subr.bf16.mxu1 %v1449_v32  ;;  %777 = vst.msk [vmem:[#allocation2 + $0x268] sm:$0xff] %vm772_vm13, %v739_v36  ;;  %v741_v38 = vpop.permute.xlu1 %740  ;;  %v1544_v44 = vld [vmem:[#allocation2 + $0x530] sm:$0xff]  ;;  %v1569_v32 = vld [vmem:[#allocation2 + $0x5f8] sm:$0xff] }
 0x10b   :  { %v1545_v37 = vld [vmem:[#allocation2 + $0x538] sm:$0xff]  ;;  %1919 = vmatpush1.bf16.msra.mxu1 %v1448_v34  ;;  %778 = vst.msk [vmem:[#allocation2 + $0x270] sm:$0xff] %vm770_vm12, %v741_v38  ;;  %2081 = vmatmul.mubr.bf16.gmra.mrb[4].mxu0 %v2531_v30  ;;  %v1567_v30 = vld [vmem:[#allocation2 + $0x5e8] sm:$0xff] }
 0x10c   :  { %779 = vst.msk [vmem:[#allocation2 + $0x278] sm:$0xff] %vm772_vm13, %v741_v38  ;;  %2106 = vmatpush1.bf16.msra.mxu0 %v1542_v35  ;;  %2090 = vmatprep.mubr.bf16.mxu0 %v2537_v31  ;;  %v1450_v43 = vld [vmem:[#allocation2 + $0x240] sm:$0xff]  ;;  %v743_v45 = vpop.permute.xlu0 %742  ;;  %v2551_v34 = vld [vmem:[%s3610_s1 + $0x8c] ss:$48 sps:$4 sm:$0xff]   ;;  %v2553_v36 = vld [vmem:[%s3610_s1 + $0x88] ss:$48 sps:$4 sm:$0xff]  }
 0x10d   :  { %v1451_v42 = vld [vmem:[#allocation2 + $0x248] sm:$0xff]  ;;  %2107 = vmatprep.subr.bf16.mxu0 %v1545_v37  ;;  %780 = vst.msk [vmem:[#allocation2 + $0x280] sm:$0xff] %vm770_vm12, %v743_v45  ;;  %v2550_v35 = vld [vmem:[%s3610_s1 + $0x70] ss:$48 sps:$4 sm:$0xff]  }
 0x10e   :  { %1920 = vmatprep.subr.bf16.mxu1 %v1451_v42  ;;  %781 = vst.msk [vmem:[#allocation2 + $0x288] sm:$0xff] %vm772_vm13, %v743_v45  ;;  %v745_v49 = vpop.permute.xlu1 %744  ;;  %1902 = vmatmul.mubr.bf16.gmra.mrb[8].mxu1 %v2535_v39  ;;  %v1452_v51 = vld [vmem:[#allocation2 + $0x250] sm:$0xff]  ;;  %v2559_v38 = vld [vmem:[%s3610_s1 + $0xe8] ss:$48 sps:$4 sm:$0xff]  }
 0x10f   :  { %v1453_v46 = vld [vmem:[#allocation2 + $0x258] sm:$0xff]  ;;  %1921 = vmatpush1.bf16.msra.mxu1 %v1450_v43  ;;  %782 = vst.msk [vmem:[#allocation2 + $0x290] sm:$0xff] %vm770_vm12, %v745_v49  ;;  %1944 = vmatprep.mubr.bf16.mxu1 %v2543_v41  ;;  %v2556_v37 = vld [vmem:[%s3610_s1 + $0xd0] ss:$48 sps:$4 sm:$0xff]  }
 0x110   :  { %783 = vst.msk [vmem:[#allocation2 + $0x298] sm:$0xff] %vm772_vm13, %v745_v49  ;;  %2108 = vmatpush1.bf16.msra.mxu0 %v1544_v44  ;;  %1922 = vmatprep.subr.bf16.mxu1 %v1453_v46  ;;  %v747_v53 = vpop.permute.xlu0 %746  ;;  %v1454_v59 = vld [vmem:[#allocation2 + $0x260] sm:$0xff] }
 0x111   :  { %2109 = vmatprep.subr.bf16.mxu0 %v1547_v48  ;;  %v1455_v52 = vld [vmem:[#allocation2 + $0x268] sm:$0xff]  ;;  %784 = vst.msk [vmem:[#allocation2 + $0x2a0] sm:$0xff] %vm770_vm12, %v747_v53 }
 0x112   :  { %785 = vst.msk [vmem:[#allocation2 + $0x2a8] sm:$0xff] %vm772_vm13, %v747_v53  ;;  %v749_v57 = vpop.permute.xlu1 %748  ;;  %v1456_v2 = vld [vmem:[#allocation2 + $0x270] sm:$0xff] }
 0x113   :  { %1923 = vmatpush1.bf16.msra.mxu1 %v1452_v51  ;;  %786 = vst.msk [vmem:[#allocation2 + $0x2b0] sm:$0xff] %vm770_vm12, %v749_v57  ;;  %2091 = vmatmul.mubr.bf16.gmra.mrb[8].mxu0 %v2539_v50  ;;  %v1457_v60 = vld [vmem:[#allocation2 + $0x278] sm:$0xff] }
 0x114   :  { %787 = vst.msk [vmem:[#allocation2 + $0x2b8] sm:$0xff] %vm772_vm13, %v749_v57  ;;  %2110 = vmatpush1.bf16.msra.mxu0 %v2560_v58  ;;  %1924 = vmatprep.subr.bf16.mxu1 %v1455_v52  ;;  %v751_v62 = vpop.permute.xlu0 %750  ;;  %v1458_v9 = vld [vmem:[#allocation2 + $0x280] sm:$0xff] }
 0x115   :  { %2111 = vmatprep.subr.bf16.mxu0 %v1549_v56  ;;  %2133 = vmatprep.mubr.bf16.mxu0 %v2547_v55  ;;  %788 = vst.msk [vmem:[#allocation2 + $0x2c0] sm:$0xff] %vm770_vm12, %v751_v62  ;;  %v1459_v3 = vld [vmem:[#allocation2 + $0x288] sm:$0xff] }
 0x116   :  { %789 = vst.msk [vmem:[#allocation2 + $0x2c8] sm:$0xff] %vm772_vm13, %v751_v62  ;;  %v753_v0 = vpop.permute.xlu1 %752  ;;  %v1460_v13 = vld [vmem:[#allocation2 + $0x290] sm:$0xff] }
 0x117   :  { %1925 = vmatpush1.bf16.msra.mxu1 %v1454_v59  ;;  %790 = vst.msk [vmem:[#allocation2 + $0x2d0] sm:$0xff] %vm770_vm12, %v753_v0  ;;  %v1461_v10 = vld [vmem:[#allocation2 + $0x298] sm:$0xff] }
 0x118   :  { %791 = vst.msk [vmem:[#allocation2 + $0x2d8] sm:$0xff] %vm772_vm13, %v753_v0  ;;  %2112 = vmatpush1.bf16.msra.mxu0 %v2561_v1  ;;  %1926 = vmatprep.subr.bf16.mxu1 %v1457_v60  ;;  %v755_v4 = vpop.permute.xlu0 %754  ;;  %v1462_v18 = vld [vmem:[#allocation2 + $0x2a0] sm:$0xff] }
 0x119   :  { %2113 = vmatprep.subr.bf16.mxu0 %v1551_v63  ;;  %792 = vst.msk [vmem:[#allocation2 + $0x2e0] sm:$0xff] %vm770_vm12, %v755_v4  ;;  %v1463_v15 = vld [vmem:[#allocation2 + $0x2a8] sm:$0xff] }
 0x11a   :  { %793 = vst.msk [vmem:[#allocation2 + $0x2e8] sm:$0xff] %vm772_vm13, %v755_v4  ;;  %v757_v7 = vpop.permute.xlu1 %756  ;;  %v1464_v21 = vld [vmem:[#allocation2 + $0x2b0] sm:$0xff] }
 0x11b   :  { %1927 = vmatpush1.bf16.msra.mxu1 %v1456_v2  ;;  %794 = vst.msk [vmem:[#allocation2 + $0x2f0] sm:$0xff] %vm770_vm12, %v757_v7  ;;  %v1465_v19 = vld [vmem:[#allocation2 + $0x2b8] sm:$0xff] }
 0x11c   :  { %795 = vst.msk [vmem:[#allocation2 + $0x2f8] sm:$0xff] %vm772_vm13, %v757_v7  ;;  %2114 = vmatpush1.bf16.msra.mxu0 %v2562_v8  ;;  %1928 = vmatprep.subr.bf16.mxu1 %v1459_v3  ;;  %v1466_v24 = vld [vmem:[#allocation2 + $0x2c0] sm:$0xff] }
 0x11d   :  { %2115 = vmatprep.subr.bf16.mxu0 %v1553_v6  ;;  %v1467_v22 = vld [vmem:[#allocation2 + $0x2c8] sm:$0xff] }
 0x11e   :  { %v1468_v27 = vld [vmem:[#allocation2 + $0x2d0] sm:$0xff] }
 0x11f   :  { %1929 = vmatpush1.bf16.msra.mxu1 %v1458_v9  ;;  %v1469_v25 = vld [vmem:[#allocation2 + $0x2d8] sm:$0xff] }
 0x120   :  { %2116 = vmatpush1.bf16.msra.mxu0 %v2563_v12  ;;  %1930 = vmatprep.subr.bf16.mxu1 %v1461_v10  ;;  %v1470_v29 = vld [vmem:[#allocation2 + $0x2e0] sm:$0xff] }
 0x121   :  { %2117 = vmatprep.subr.bf16.mxu0 %v1555_v11 }
 0x122   :  { %v1472_v31 = vld [vmem:[#allocation2 + $0x2f0] sm:$0xff] }
 0x123   :  { %1931 = vmatpush1.bf16.msra.mxu1 %v1460_v13 }
 0x124   :  { %2118 = vmatpush1.bf16.msra.mxu0 %v2564_v17  ;;  %1932 = vmatprep.subr.bf16.mxu1 %v1463_v15 }
 0x125   :  { %2119 = vmatprep.subr.bf16.mxu0 %v1557_v16 }
 0x127   :  { %1933 = vmatpush1.bf16.msra.mxu1 %v1462_v18 }
 0x128   :  { %2120 = vmatpush1.bf16.msra.mxu0 %v3312_v33  ;;  %1934 = vmatprep.subr.bf16.mxu1 %v1465_v19  ;;  %v1471_v33 = vld [vmem:[#allocation2 + $0x2e8] sm:$0xff] }
 0x129   :  { %2121 = vmatprep.subr.bf16.mxu0 %v1559_v20 }
 0x12b   :  { %1935 = vmatpush1.bf16.msra.mxu1 %v1464_v21 }
 0x12c   :  { %2122 = vmatpush1.bf16.msra.mxu0 %v3323_v40  ;;  %1936 = vmatprep.subr.bf16.mxu1 %v1467_v22  ;;  %v1473_v40 = vld [vmem:[#allocation2 + $0x2f8] sm:$0xff] }
 0x12d   :  { %2123 = vmatprep.subr.bf16.mxu0 %v1561_v23 }
 0x12f   :  { %1937 = vmatpush1.bf16.msra.mxu1 %v1466_v24 }
 0x130   :  { %2124 = vmatpush1.bf16.msra.mxu0 %v3332_v47  ;;  %1938 = vmatprep.subr.bf16.mxu1 %v1469_v25  ;;  %v2541_v47 = vld [vmem:[%s3610_s1 + $0x10] ss:$48 sps:$4 sm:$0xff]  }
 0x131   :  { %2125 = vmatprep.subr.bf16.mxu0 %v1563_v26 }
 0x133   :  { %1939 = vmatpush1.bf16.msra.mxu1 %v1468_v27 }
 0x134   :  { %2126 = vmatpush1.bf16.msra.mxu0 %v3341_v54  ;;  %1940 = vmatprep.subr.bf16.mxu1 %v1471_v33  ;;  %v2548_v54 = vld [vmem:[%s3610_s1 + $0x74] ss:$48 sps:$4 sm:$0xff]  }
 0x135   :  { %2127 = vmatprep.subr.bf16.mxu0 %v1565_v28 }
 0x137   :  { %1941 = vmatpush1.bf16.msra.mxu1 %v1470_v29  ;;  %v1579_v41 = vpop.permute.xlu0 %1578 }
 0x138   :  { %2128 = vmatpush1.bf16.msra.mxu0 %v3350_v61  ;;  %1942 = vmatprep.subr.bf16.mxu1 %v1473_v40  ;;  %v2545_v61 = vld [vmem:[%s3610_s1 + $0x28] ss:$48 sps:$4 sm:$0xff]   ;;  %v1584_v44 = vpop.permute.xlu1 %1583 }
 0x139   :  { %2129 = vmatprep.subr.bf16.mxu0 %v1567_v30 }
 0x13b   :  { %1943 = vmatpush1.bf16.msra.mxu1 %v1472_v31 }
 0x13c   :  { %2130 = vmatpush1.bf16.msra.mxu0 %v3362_v5  ;;  %v2554_v5 = vld [vmem:[%s3610_s1 + $0xd4] ss:$48 sps:$4 sm:$0xff]   ;;  %v1589_v62 = vpop.permute.xlu1 %1588 }
 0x13d   :  { %2131 = vmatprep.subr.bf16.mxu0 %v1569_v32 }
 0x13e   :  { %1945 = vmatmul.mubr.bf16.vlgmr.msra.gmra.mrb[0].mxu1 %v2541_v47 }
 0x13f   :  { %1954 = vmatprep.mubr.bf16.mxu1 %v2548_v54  ;;  %v1594_v1 = vpop.permute.xlu0 %1593 }
 0x140   :  { %2132 = vmatpush1.bf16.msra.mxu0 %v3379_v14  ;;  %v2557_v14 = vld [vmem:[%s3610_s1 + $0xec] ss:$48 sps:$4 sm:$0xff]   ;;  %s2597_s1 = smov [#allocation3]  }
 0x141   :  { %s2182_s26 = sshll.u32 %s2597_s1, 4  ;;  %s2183_s26 = int_to_ptr.vmem [resolvable:$true] %s2182_s26 }
 0x142   :  { %s2565_s27 = scalar_lea.vmem %s2183_s26, 1536  ;;  %p2570_p1 = scmp.lt.s32.totalorder %s2183_s26, %s2183_s26 }
 0x143   :  { %2134 = vmatmul.mubr.bf16.vlgmr.msra.gmra.mrb[0].mxu0 %v2545_v61  ;;  %p2566_p0 = scmp.ne.s32.totalorder %s2183_s26, %s2565_s27  ;;  %p2571_p2 = scmp.lt.s32.totalorder %s2565_s27, %s2565_s27 }
 0x144   :  { %2143 = vmatprep.mubr.bf16.mxu0 %v2551_v34  ;;  %v1604_v23 = vpop.permute.xlu0 %1603 }
 0x145   :  { %p2572_p3 = por %p2571_p2, %p2570_p1 }
 0x146   :  { %1955 = vmatmul.mubr.bf16.gmra.mrb[4].mxu1 %v2550_v35 }
 0x147   :  { %1964 = vmatprep.mubr.bf16.mxu1 %v2554_v5  ;;  %v1599_v20 = vpop.permute.xlu1 %1598  ;;  %p2573_p4 = pnand %p2572_p3, %p2566_p0 }
 0x14b   :  { %2144 = vmatmul.mubr.bf16.gmra.mrb[4].mxu0 %v2553_v36 }
 0x14c   :  { %2153 = vmatprep.mubr.bf16.mxu0 %v2557_v14 }
 0x14e   :  { %1965 = vmatmul.mubr.bf16.gmra.mrb[8].mxu1 %v2556_v37 }
 0x153   :  { %2154 = vmatmul.mubr.bf16.gmra.mrb[8].mxu0 %v2559_v38 }
 0x211   :  { %v1946_v39 = vpop.f32.mrb[0].mxu1 }
 0x212   :  { %v1948_v42 = vpop.f32.mrb[1].mxu1  ;;  %v2325_v46 = vadd.f32 %v1946_v39, %v1579_v41 }
 0x213   :  { %v1950_v43 = vpop.f32.mrb[2].mxu1  ;;  %v2327_v48 = vadd.f32 %v1948_v42, %v1579_v41 }
 0x214   :  { %v1952_v45 = vpop.f32.mrb[3].mxu1  ;;  %v2329_v50 = vadd.f32 %v1950_v43, %v1584_v44 }
 0x215   :  { %v2331_v53 = vadd.f32 %v1952_v45, %v1584_v44 }
 0x216   :  { %v2135_v49 = vpop.f32.mrb[0].mxu0 }
 0x217   :  { %v2326_v51 = vadd.f32 %v2325_v46, %v2135_v49  ;;  %v2137_v52 = vpop.f32.mrb[1].mxu0 }
 0x218   :  { %v2328_v55 = vadd.f32 %v2327_v48, %v2137_v52  ;;  %v2139_v56 = vpop.f32.mrb[2].mxu0 }
 0x219   :  { %2164 = vst [vmem:[#allocation3] sm:$0xff] %v2326_v51  ;;  %v2330_v57 = vadd.f32 %v2329_v50, %v2139_v56  ;;  %v2141_v58 = vpop.f32.mrb[3].mxu0  ;;  %v1956_v59 = vpop.f32.mrb[4].mxu1 }
 0x21a   :  { %2166 = vst.msk [vmem:[#allocation3 + $0x8] sm:$0xff] %vm21_vm0, %v2328_v55  ;;  %v2332_v60 = vadd.f32 %v2331_v53, %v2141_v58  ;;  %v1958_v63 = vpop.f32.mrb[5].mxu1  ;;  %v2333_v3 = vadd.f32 %v1956_v59, %v1589_v62 }
 0x21b   :  { %2167 = vst [vmem:[#allocation3 + $0x10] sm:$0xff] %v2330_v57  ;;  %v1960_v0 = vpop.f32.mrb[6].mxu1  ;;  %v2335_v4 = vadd.f32 %v1958_v63, %v1589_v62 }
 0x21c   :  { %2168 = vst.msk [vmem:[#allocation3 + $0x18] sm:$0xff] %vm21_vm0, %v2332_v60  ;;  %v1962_v2 = vpop.f32.mrb[7].mxu1  ;;  %v2337_v7 = vadd.f32 %v1960_v0, %v1594_v1 }
 0x21d   :  { %v2339_v10 = vadd.f32 %v1962_v2, %v1594_v1 }
 0x21e   :  { %v2145_v6 = vpop.f32.mrb[4].mxu0 }
 0x21f   :  { %v2334_v8 = vadd.f32 %v2333_v3, %v2145_v6  ;;  %v2147_v9 = vpop.f32.mrb[5].mxu0 }
 0x220   :  { %v2336_v11 = vadd.f32 %v2335_v4, %v2147_v9  ;;  %v2149_v12 = vpop.f32.mrb[6].mxu0 }
 0x221   :  { %2169 = vst [vmem:[#allocation3 + $0x20] sm:$0xff] %v2334_v8  ;;  %v2338_v13 = vadd.f32 %v2337_v7, %v2149_v12  ;;  %v2151_v15 = vpop.f32.mrb[7].mxu0  ;;  %v1966_v16 = vpop.f32.mrb[8].mxu1 }
 0x222   :  { %2170 = vst.msk [vmem:[#allocation3 + $0x28] sm:$0xff] %vm21_vm0, %v2336_v11  ;;  %v2340_v17 = vadd.f32 %v2339_v10, %v2151_v15  ;;  %v1968_v18 = vpop.f32.mrb[9].mxu1  ;;  %v2341_v22 = vadd.f32 %v1966_v16, %v1599_v20 }
 0x223   :  { %2171 = vst [vmem:[#allocation3 + $0x30] sm:$0xff] %v2338_v13  ;;  %v1970_v19 = vpop.f32.mrb[10].mxu1  ;;  %v2343_v24 = vadd.f32 %v1968_v18, %v1599_v20 }
 0x224   :  { %2172 = vst.msk [vmem:[#allocation3 + $0x38] sm:$0xff] %vm21_vm0, %v2340_v17  ;;  %v1972_v21 = vpop.f32.mrb[11].mxu1  ;;  %v2345_v26 = vadd.f32 %v1970_v19, %v1604_v23 }
 0x225   :  { %v2347_v28 = vadd.f32 %v1972_v21, %v1604_v23 }
 0x226   :  { %v2155_v25 = vpop.f32.mrb[8].mxu0 }
 0x227   :  { %v2342_v27 = vadd.f32 %v2341_v22, %v2155_v25  ;;  %v2157_v33 = vpop.f32.mrb[9].mxu0 }
 0x228   :  { %v2344_v29 = vadd.f32 %v2343_v24, %v2157_v33  ;;  %v2159_v40 = vpop.f32.mrb[10].mxu0 }
 0x229   :  { %2173 = vst [vmem:[#allocation3 + $0x40] sm:$0xff] %v2342_v27  ;;  %v2346_v30 = vadd.f32 %v2345_v26, %v2159_v40  ;;  %v2161_v31 = vpop.f32.mrb[11].mxu0 }
 0x22a   :  { %2174 = vst.msk [vmem:[#allocation3 + $0x48] sm:$0xff] %vm21_vm0, %v2344_v29  ;;  %v2348_v47 = vadd.f32 %v2347_v28, %v2161_v31 }
 0x22b   :  { %2175 = vst [vmem:[#allocation3 + $0x50] sm:$0xff] %v2346_v30 }
 0x22c   :  { %2176 = vst.msk [vmem:[#allocation3 + $0x58] sm:$0xff] %vm21_vm0, %v2348_v47 }
 0x22d   :  { %2576 = shalt.err (!%p2573_p4)
}
 0x22e   :  { %s2577_s30 = scalar_lea.hbm %s3612_s3, 1536 }
 0x22f   :  { %p2578_p5 = scmp.ne.s32.totalorder %s3612_s3, %s2577_s30  ;;  %p2581_p6 = scmp.lt.u32.totalorder %s2577_s30, %s3612_s3 }
 0x231   :  { %p2583_p7 = pnand %p2581_p6, %p2578_p5 }
 0x233   :  { %2586 = shalt.err (!%p2583_p7)
}
 0x234   :  { %s2598_s8 = smov 256   ;;  %s2599_s9 = smov 16  }
 0x235   :  { %2188 = dma.vmem_to_hbm [thread:$0]  %s2183_s26, 1536, %s3612_s3, [#allocation4], %s2598_s8, %s2598_s8, %s2599_s9  }
 0x236   :  { %2587 = dma.done.wait [#allocation4], 1536  }
 0x237   :  { %2588 = vsyncadd [#allocation4], 4294965760 }
 0x238   :  { %2192 = vsyncpa [#allocation4], 1 }

</bundles_post_ra>
